<compile_context>
chip_gen: v7x
topology: tpu7x:2x2x1
jax: 0.10.0
libtpu: 0.0.40
codegen_flags: <defaults>
</compile_context>

<pallas_src>
import functools

import jax
import jax.numpy as jnp
from jax import lax
from jax.experimental import pallas as pl
from jax.experimental.pallas import tpu as pltpu


def _chamfer_kernel(x_ref, y_ref, out_ref, rx_ref, minj_ref, *,
                    ny_real, tny, ny_tiles):
    """One grid step = (one batch tile) x (one Ny tile).

    x_ref:    (Bt, Nx, D)   gts block (resident across the Ny axis)
    y_ref:    (Bt, D, Tny)  preds block, pre-transposed + lane-padded
    out_ref:  (Bt, 1)       per-batch loss (resident across the Ny axis)
    rx_ref:   (Bt, Nx, 1)   scratch: ||x_i||^2 column, computed at jt == 0
    minj_ref: (Bt, Nx, 1)   scratch: running min_j ||x_i - y_j||^2
    """
    jt = pl.program_id(1)

    x = x_ref[...]                                             # (Bt, Nx, D)
    y = y_ref[...]                                             # (Bt, D, Tny)

    @pl.when(jt == 0)
    def _():
        out_ref[...] = jnp.zeros_like(out_ref)
        minj_ref[...] = jnp.full(minj_ref.shape, jnp.inf, minj_ref.dtype)
        # ||x_i||^2 as a column, computed once per batch tile and reused
        # across every Ny tile (hoists it out of the reduction loop).
        rx_ref[...] = jnp.sum(x * x, axis=2, keepdims=True)    # (Bt, Nx, 1)

    # zz[b, i, j] = x[b, i, :] . y[b, :, j]  -- canonical batched matmul on
    # the MXU; RHS is already (K, N) so no transpose is materialized.
    zz = lax.dot_general(
        x, y,
        dimension_numbers=(((2,), (1,)), ((0,), (0,))),
        preferred_element_type=jnp.float32)                    # (Bt, Nx, Tny)

    ry = jnp.sum(y * y, axis=1, keepdims=True)                 # (Bt, 1, Tny)
    p = rx_ref[...] + ry - 2.0 * zz                            # (Bt, Nx, Tny)

    bt = p.shape[0]
    padded_cols = ny_tiles * tny > ny_real
    if padded_cols:
        col_valid = (lax.broadcasted_iota(jnp.int32, (bt, 1, tny), 2)
                     + jt * tny) < ny_real                     # (Bt, 1, Tny)

    # ---- loss_1: sum over (real) pred points j of min_i P[i, j].
    # Complete within this Ny tile -> accumulate directly into the output.
    min_over_i = jnp.min(p, axis=1, keepdims=True)             # (Bt, 1, Tny)
    if padded_cols:
        min_over_i = jnp.where(col_valid, min_over_i, 0.0)
    out_ref[...] += jnp.sum(min_over_i, axis=2)                # (Bt, 1)

    # ---- loss_2: running min over pred tiles; summed over gts points at
    # the last Ny tile.  Padded pred columns are masked to +inf.
    p_cols = jnp.where(col_valid, p, jnp.inf) if padded_cols else p
    minj_ref[...] = jnp.minimum(minj_ref[...],
                                jnp.min(p_cols, axis=2, keepdims=True))

    @pl.when(jt == ny_tiles - 1)
    def _():
        out_ref[...] += jnp.sum(minj_ref[...], axis=1)         # (Bt, 1)


def chamfer_loss(preds: jax.Array, gts: jax.Array) -> jax.Array:
    """Pallas ChamferLoss forward. preds: (B, Ny, D), gts: (B, Nx, D)."""
    B, Ny, D = preds.shape
    Bg, Nx, Dg = gts.shape
    assert B == Bg and D == Dg

    LANE = 128

    # gts stay in natural (B, Nx, D) layout (full block per batch element).
    x_in = gts.astype(jnp.float32)

    # preds: (B, Ny, D) -> (B, D, Ny), lane-pad Ny to a multiple of 128 so
    # every P tile / min reduction runs on lane-dense vregs.  Padded pred
    # columns are masked inside the kernel.
    nyp = -(-Ny // LANE) * LANE
    y_in = jnp.transpose(preds.astype(jnp.float32), (0, 2, 1))  # (B, D, Ny)
    if nyp != Ny:
        y_in = jnp.pad(y_in, ((0, 0), (0, 0), (0, nyp - Ny)))

    # ---- tile sizing against an explicit VMEM budget --------------------
    vmem_limit = 32 * 1024 * 1024          # safe on v5e / v6e / v7x
    vmem_budget = 24 * 1024 * 1024         # leave headroom under the limit

    nx8 = -(-Nx // 8) * 8                  # sublane-padded Nx (footprint est.)
    d_lanes = -(-D // LANE) * LANE         # lane-padded D for x blocks
    d_sub = -(-D // 8) * 8                 # sublane-padded D for y blocks

    def vmem_est(bt_, tny_):
        x_b = 2 * bt_ * nx8 * d_lanes * 4          # double-buffered x blocks
        y_b = 2 * bt_ * d_sub * tny_ * 4           # double-buffered y blocks
        p_b = 2 * bt_ * nx8 * tny_ * 4             # P tile + masked temp
        s_b = 2 * bt_ * nx8 * LANE * 4             # rx / running-min scratch
        return x_b + y_b + p_b + s_b

    # Ny tile width: largest of {512, 256, 128} that divides padded Ny and
    # fits the budget at bt = 1.
    tny = LANE
    for cand in (512, 256, 128):
        if nyp % cand == 0 and vmem_est(1, cand) <= vmem_budget:
            tny = cand
            break
    ny_tiles = nyp // tny

    # Batch-tile size: largest divisor of B (<= 8) that fits the budget.
    bt = 1
    for cand in range(min(B, 8), 0, -1):
        if B % cand == 0 and vmem_est(cand, tny) <= vmem_budget:
            bt = cand
            break
    # TODO(synk): for very large Nx (where an (Nx, 128) f32 P tile no longer
    # fits VMEM) add an Nx grid axis with a running-min scratch for loss_1.

    kernel = functools.partial(
        _chamfer_kernel, ny_real=Ny, tny=tny, ny_tiles=ny_tiles)

    out = pl.pallas_call(
        kernel,
        out_shape=jax.ShapeDtypeStruct((B, 1), jnp.float32),
        grid_spec=pltpu.PrefetchScalarGridSpec(
            num_scalar_prefetch=0,
            grid=(B // bt, ny_tiles),
            in_specs=[
                pl.BlockSpec((bt, Nx, D), lambda b, j: (b, 0, 0)),   # gts
                pl.BlockSpec((bt, D, tny), lambda b, j: (b, 0, j)),  # preds^T
            ],
            out_specs=pl.BlockSpec((bt, 1), lambda b, j: (b, 0)),
            scratch_shapes=[
                pltpu.VMEM((bt, Nx, 1), jnp.float32),   # rx = ||x_i||^2
                pltpu.VMEM((bt, Nx, 1), jnp.float32),   # running min over j
            ],
        ),
        compiler_params=pltpu.CompilerParams(
            dimension_semantics=("parallel", "arbitrary"),
            vmem_limit_bytes=vmem_limit,
        ),
    )(x_in, y_in)

    return jnp.sum(out)


def _chamfer_loss_ref(preds, gts):
    """Pure-JAX reference mirroring the PyTorch module."""
    x = gts.astype(jnp.float32)
    y = preds.astype(jnp.float32)
    zz = jnp.einsum("bid,bjd->bij", x, y)
    rx = jnp.sum(x * x, axis=-1)[:, :, None]
    ry = jnp.sum(y * y, axis=-1)[:, None, :]
    P = rx + ry - 2.0 * zz
    return jnp.sum(jnp.min(P, axis=1)) + jnp.sum(jnp.min(P, axis=2))


if __name__ == "__main__":
    key = jax.random.PRNGKey(0)
    k1, k2, k3, k4 = jax.random.split(key, 4)

    # Config 1: Ny = 64 exercises lane padding + column masking (single tile).
    B, Nx, Ny, D = 2, 128, 64, 8
    gts = jax.random.normal(k1, (B, Nx, D), dtype=jnp.float32)
    preds = jax.random.normal(k2, (B, Ny, D), dtype=jnp.float32)
    loss = jax.block_until_ready(chamfer_loss(preds, gts))
    ref = jax.block_until_ready(_chamfer_loss_ref(preds, gts))
    assert jnp.allclose(loss, ref, rtol=1e-4, atol=1e-2), (loss, ref)

    # Config 2: non-aligned Nx, D=3, multiple Ny tiles (running-min path).
    B2, Nx2, Ny2, D2 = 2, 100, 384, 3
    gts2 = jax.random.normal(k3, (B2, Nx2, D2), dtype=jnp.float32)
    preds2 = jax.random.normal(k4, (B2, Ny2, D2), dtype=jnp.float32)
    loss2 = jax.block_until_ready(chamfer_loss(preds2, gts2))
    ref2 = jax.block_until_ready(_chamfer_loss_ref(preds2, gts2))
    assert jnp.allclose(loss2, ref2, rtol=1e-4, atol=1e-2), (loss2, ref2)

    print("KERNEL_OK")
</pallas_src>

<mosaic_0001>
module attributes {stable_mosaic.version = 11 : i64} {
  func.func @_chamfer_kernel(%arg0: i32, %arg1: i32, %arg2: memref<2x128x8xf32, #tpu.memory_space<vmem>>, %arg3: memref<2x8x128xf32, #tpu.memory_space<vmem>>, %arg4: memref<2x1xf32, #tpu.memory_space<vmem>>, %arg5: memref<2x128x1xf32, #tpu.memory_space<vmem>>, %arg6: memref<2x128x1xf32, #tpu.memory_space<vmem>>) attributes {dimension_semantics = [#tpu.dimension_semantics<parallel>, #tpu.dimension_semantics<arbitrary>], iteration_bounds = array<i64: 1, 1>, scalar_prefetch = 0 : i64, scratch_operands = 2 : i64, tpu.core_type = #tpu.core_type<tc>, window_params = [{transform_indices = @transform_0, window_bounds = array<i64: 2, 128, 8>}, {transform_indices = @transform_1, window_bounds = array<i64: 2, 8, 128>}, {transform_indices = @transform_2, window_bounds = array<i64: 2, 1>}]} {
    %c0 = arith.constant 0 : index
    %c0_0 = arith.constant 0 : index
    %c0_1 = arith.constant 0 : index
    %0 = vector.load %arg2[%c0, %c0_0, %c0_1] : memref<2x128x8xf32, #tpu.memory_space<vmem>>, vector<2x128x8xf32>
    %c0_2 = arith.constant 0 : index
    %c0_3 = arith.constant 0 : index
    %c0_4 = arith.constant 0 : index
    %1 = vector.load %arg3[%c0_2, %c0_3, %c0_4] : memref<2x8x128xf32, #tpu.memory_space<vmem>>, vector<2x8x128xf32>
    %c0_i32 = arith.constant 0 : i32
    %2 = arith.cmpi eq, %arg1, %c0_i32 : i32
    %3 = arith.extui %2 : i1 to i32
    %c0_i32_5 = arith.constant 0 : i32
    %4 = arith.cmpi ne, %3, %c0_i32_5 : i32
    scf.if %4 {
      %cst_28 = arith.constant 0.000000e+00 : f32
      %42 = vector.broadcast %cst_28 : f32 to vector<2x1xf32>
      %c0_29 = arith.constant 0 : index
      %c0_30 = arith.constant 0 : index
      %43 = vector.load %arg4[%c0_29, %c0_30] : memref<2x1xf32, #tpu.memory_space<vmem>>, vector<2x1xf32>
      tpu.vector_store %arg4[%c0_29, %c0_30], %42 {strides = array<i32>} : memref<2x1xf32, #tpu.memory_space<vmem>>, vector<2x1xf32>,
      %cst_31 = arith.constant 0x7F800000 : f32
      %44 = vector.broadcast %cst_31 : f32 to vector<2x128x1xf32>
      %c0_32 = arith.constant 0 : index
      %c0_33 = arith.constant 0 : index
      %c0_34 = arith.constant 0 : index
      %45 = vector.load %arg6[%c0_32, %c0_33, %c0_34] : memref<2x128x1xf32, #tpu.memory_space<vmem>>, vector<2x128x1xf32>
      tpu.vector_store %arg6[%c0_32, %c0_33, %c0_34], %44 {strides = array<i32>} : memref<2x128x1xf32, #tpu.memory_space<vmem>>, vector<2x128x1xf32>,
      %46 = arith.mulf %0, %0 : vector<2x128x8xf32>
      %cst_35 = arith.constant dense<0.000000e+00> : vector<2x128xf32>
      %47 = vector.multi_reduction <add>, %46, %cst_35 [2] : vector<2x128x8xf32> to vector<2x128xf32>
      %48 = vector.shape_cast %47 : vector<2x128xf32> to vector<2x128x1xf32>
      %c0_36 = arith.constant 0 : index
      %c0_37 = arith.constant 0 : index
      %c0_38 = arith.constant 0 : index
      %49 = vector.load %arg5[%c0_36, %c0_37, %c0_38] : memref<2x128x1xf32, #tpu.memory_space<vmem>>, vector<2x128x1xf32>
      tpu.vector_store %arg5[%c0_36, %c0_37, %c0_38], %48 {strides = array<i32>} : memref<2x128x1xf32, #tpu.memory_space<vmem>>, vector<2x128x1xf32>,
    } else {
    }
    %cst = arith.constant dense<0.000000e+00> : vector<2x128x128xf32>
    %5 = tpu.matmul %0, %1, %cst {dimension_numbers = #tpu.dot_dimension_numbers<[2], [1], [1], [2], [0, 0, 0, 1, 1, 2], [0], [0]>} : vector<2x128x8xf32>, vector<2x8x128xf32>, vector<2x128x128xf32> -> vector<2x128x128xf32>
    %6 = arith.mulf %1, %1 : vector<2x8x128xf32>
    %cst_6 = arith.constant dense<0.000000e+00> : vector<2x128xf32>
    %7 = vector.multi_reduction <add>, %6, %cst_6 [1] : vector<2x8x128xf32> to vector<2x128xf32>
    %8 = vector.shape_cast %7 : vector<2x128xf32> to vector<2x1x128xf32>
    %c0_7 = arith.constant 0 : index
    %c0_8 = arith.constant 0 : index
    %c0_9 = arith.constant 0 : index
    %9 = vector.load %arg5[%c0_7, %c0_8, %c0_9] : memref<2x128x1xf32, #tpu.memory_space<vmem>>, vector<2x128x1xf32>
    %10 = vector.broadcast %9 : vector<2x128x1xf32> to vector<2x128x128xf32>
    %11 = vector.broadcast %8 : vector<2x1x128xf32> to vector<2x128x128xf32>
    %12 = arith.addf %10, %11 : vector<2x128x128xf32>
    %cst_10 = arith.constant 2.000000e+00 : f32
    %13 = vector.broadcast %cst_10 : f32 to vector<2x128x128xf32>
    %14 = arith.mulf %13, %5 : vector<2x128x128xf32>
    %15 = arith.subf %12, %14 : vector<2x128x128xf32>
    %16 = tpu.iota {dimensions = array<i32: 2>} : vector<2x1x128xi32>
    %c128_i32 = arith.constant 128 : i32
    %17 = arith.muli %arg1, %c128_i32 : i32
    %18 = vector.broadcast %17 : i32 to vector<2x1x128xi32>
    %19 = arith.addi %16, %18 : vector<2x1x128xi32>
    %c64_i32 = arith.constant 64 : i32
    %20 = vector.broadcast %c64_i32 : i32 to vector<2x1x128xi32>
    %21 = arith.cmpi slt, %19, %20 : vector<2x1x128xi32>
    %cst_11 = arith.constant dense<0x7F800000> : vector<2x128xf32>
    %22 = vector.multi_reduction <minimumf>, %15, %cst_11 [1] : vector<2x128x128xf32> to vector<2x128xf32>
    %23 = vector.shape_cast %22 : vector<2x128xf32> to vector<2x1x128xf32>
    %cst_12 = arith.constant 0.000000e+00 : f32
    %24 = vector.broadcast %cst_12 : f32 to vector<2x1x128xf32>
    %25 = arith.select %21, %23, %24 : vector<2x1x128xi1>, vector<2x1x128xf32>
    %c0_13 = arith.constant 0 : index
    %c0_14 = arith.constant 0 : index
    %26 = vector.load %arg4[%c0_13, %c0_14] : memref<2x1xf32, #tpu.memory_space<vmem>>, vector<2x1xf32>
    %cst_15 = arith.constant dense<0.000000e+00> : vector<2x1xf32>
    %27 = vector.multi_reduction <add>, %25, %cst_15 [2] : vector<2x1x128xf32> to vector<2x1xf32>
    %28 = arith.addf %26, %27 : vector<2x1xf32>
    %c0_16 = arith.constant 0 : index
    %c0_17 = arith.constant 0 : index
    %29 = vector.load %arg4[%c0_16, %c0_17] : memref<2x1xf32, #tpu.memory_space<vmem>>, vector<2x1xf32>
    tpu.vector_store %arg4[%c0_16, %c0_17], %28 {strides = array<i32>} : memref<2x1xf32, #tpu.memory_space<vmem>>, vector<2x1xf32>,
    %cst_18 = arith.constant 0x7F800000 : f32
    %30 = vector.shape_cast %21 : vector<2x1x128xi1> to vector<2x1x128xi1>
    %31 = vector.broadcast %30 : vector<2x1x128xi1> to vector<2x128x128xi1>
    %32 = vector.broadcast %cst_18 : f32 to vector<2x128x128xf32>
    %33 = arith.select %31, %15, %32 : vector<2x128x128xi1>, vector<2x128x128xf32>
    %c0_19 = arith.constant 0 : index
    %c0_20 = arith.constant 0 : index
    %c0_21 = arith.constant 0 : index
    %34 = vector.load %arg6[%c0_19, %c0_20, %c0_21] : memref<2x128x1xf32, #tpu.memory_space<vmem>>, vector<2x128x1xf32>
    %cst_22 = arith.constant dense<0x7F800000> : vector<2x128xf32>
    %35 = vector.multi_reduction <minimumf>, %33, %cst_22 [2] : vector<2x128x128xf32> to vector<2x128xf32>
    %36 = vector.shape_cast %35 : vector<2x128xf32> to vector<2x128x1xf32>
    %37 = arith.minimumf %34, %36 : vector<2x128x1xf32>
    %c0_23 = arith.constant 0 : index
    %c0_24 = arith.constant 0 : index
    %c0_25 = arith.constant 0 : index
    %38 = vector.load %arg6[%c0_23, %c0_24, %c0_25] : memref<2x128x1xf32, #tpu.memory_space<vmem>>, vector<2x128x1xf32>
    tpu.vector_store %arg6[%c0_23, %c0_24, %c0_25], %37 {strides = array<i32>} : memref<2x128x1xf32, #tpu.memory_space<vmem>>, vector<2x128x1xf32>,
    %c0_i32_26 = arith.constant 0 : i32
    %39 = arith.cmpi eq, %arg1, %c0_i32_26 : i32
    %40 = arith.extui %39 : i1 to i32
    %c0_i32_27 = arith.constant 0 : i32
    %41 = arith.cmpi ne, %40, %c0_i32_27 : i32
    scf.if %41 {
      %c0_28 = arith.constant 0 : index
      %c0_29 = arith.constant 0 : index
      %42 = vector.load %arg4[%c0_28, %c0_29] : memref<2x1xf32, #tpu.memory_space<vmem>>, vector<2x1xf32>
      %c0_30 = arith.constant 0 : index
      %c0_31 = arith.constant 0 : index
      %c0_32 = arith.constant 0 : index
      %43 = vector.load %arg6[%c0_30, %c0_31, %c0_32] : memref<2x128x1xf32, #tpu.memory_space<vmem>>, vector<2x128x1xf32>
      %cst_33 = arith.constant dense<0.000000e+00> : vector<2x1xf32>
      %44 = vector.multi_reduction <add>, %43, %cst_33 [1] : vector<2x128x1xf32> to vector<2x1xf32>
      %45 = arith.addf %42, %44 : vector<2x1xf32>
      %c0_34 = arith.constant 0 : index
      %c0_35 = arith.constant 0 : index
      %46 = vector.load %arg4[%c0_34, %c0_35] : memref<2x1xf32, #tpu.memory_space<vmem>>, vector<2x1xf32>
      tpu.vector_store %arg4[%c0_34, %c0_35], %45 {strides = array<i32>} : memref<2x1xf32, #tpu.memory_space<vmem>>, vector<2x1xf32>,
    } else {
    }
    return
  }
  func.func @transform_0(%arg0: i32, %arg1: i32) -> (i32, i32, i32) {
    %c0_i32 = arith.constant 0 : i32
    %c0_i32_0 = arith.constant 0 : i32
    %c0_i32_1 = arith.constant 0 : i32
    return %arg0, %c0_i32, %c0_i32_0 : i32, i32, i32
  }
  func.func @transform_1(%arg0: i32, %arg1: i32) -> (i32, i32, i32) {
    %c0_i32 = arith.constant 0 : i32
    %c0_i32_0 = arith.constant 0 : i32
    return %arg0, %c0_i32, %arg1 : i32, i32, i32
  }
  func.func @transform_2(%arg0: i32, %arg1: i32) -> (i32, i32) {
    %c0_i32 = arith.constant 0 : i32
    %c0_i32_0 = arith.constant 0 : i32
    return %arg0, %c0_i32 : i32, i32
  }
}

</mosaic_0001>

<bundles_post_ra>
// kernel: tpu_custom_call.1
= control target key start
LH: loop header
LB: loop body
LE: loop exit
PB: predicated region body
PF: predicated region fallthrough
CT: control target
= control target key end

     0   :  { %vm116_vm0 = vcmask 64512   ;;  %v1435_v44 = vmov 0   ;;  %vm51_vm1 = vcmask 7168   ;;  %vm49_vm3 = vcmask 1024   ;;  %s1997_s0 = inlined_call_operand.vmem [shape: f32[2,128,8], index: 0, kind: input, shape index: {}]   ;;  %s1998_s1 = inlined_call_operand.vmem [shape: f32[2,8,128], index: 1, kind: input, shape index: {}]   ;;  %s1999_s2 = inlined_call_operand.vmem [shape: f32[2,1], index: 2, kind: output, shape index: {}]  }
   0x1   :  { %v13_v0 = vld [vmem:[%s1997_s0 + $0x10] sm:$0xff]  ;;  %v11_v1 = vld [vmem:[%s1997_s0] sm:$0xff]  ;;  %v14_v2 = vld [vmem:[%s1997_s0 + $0x18] sm:$0xff]  ;;  %1433 = vset.pattern.permute.xlu0 %v1435_v44  ;;  %1434 = vset.pattern.permute.xlu1 %v1435_v44  ;;  %vm991_vm4 = vcmask 1041409  }
   0x2   :  { %v86_v3 = vmul.f32 %v13_v0, %v13_v0  ;;  %v84_v4 = vmul.f32 %v11_v1, %v11_v1  ;;  %v87_v5 = vmul.f32 %v14_v2, %v14_v2  ;;  %v12_v6 = vld [vmem:[%s1997_s0 + $0x8] sm:$0xff]  ;;  %1380 = vmatprep.mubr.msk.f32.mxu0 %vm116_vm0, %v11_v1  ;;  %v15_v9 = vld [vmem:[%s1997_s0 + $0x20] sm:$0xff]  ;;  %v17_v17 = vld [vmem:[%s1997_s0 + $0x30] sm:$0xff] }
   0x3   :  { %v85_v7 = vmul.f32 %v12_v6, %v12_v6  ;;  %v16_v8 = vld [vmem:[%s1997_s0 + $0x28] sm:$0xff]  ;;  %v27_v10 = vld [vmem:[%s1997_s0 + $0x80] sm:$0xff]  ;;  %v88_v16 = vmul.f32 %v15_v9, %v15_v9  ;;  %v90_v21 = vmul.f32 %v17_v17, %v17_v17  ;;  %v29_v23 = vld [vmem:[%s1997_s0 + $0x90] sm:$0xff] }
   0x4   :  { %v123_v11 = vsel %vm116_vm0, %v86_v3, 0.0  ;;  %v117_v12 = vsel %vm116_vm0, %v84_v4, 0.0  ;;  %1406 = vmatprep.mubr.msk.f32.mxu1 %vm116_vm0, %v27_v10  ;;  %v126_v13 = vsel %vm116_vm0, %v87_v5, 0.0  ;;  %v89_v15 = vmul.f32 %v16_v8, %v16_v8  ;;  %v1488_v22 = vld [vmem:[%s1998_s1] sm:$0xff]  ;;  %v28_v24 = vld [vmem:[%s1997_s0 + $0x88] sm:$0xff]  ;;  %v30_v31 = vld [vmem:[%s1997_s0 + $0x98] sm:$0xff] }
   0x5   :  { %124 = vadd.xlane.f32.xlu1 %v123_v11  ;;  %118 = vadd.xlane.f32.xlu0 %v117_v12  ;;  %v120_v14 = vsel %vm116_vm0, %v85_v7, 0.0  ;;  %v129_v19 = vsel %vm116_vm0, %v88_v16, 0.0  ;;  %v100_v20 = vmul.f32 %v27_v10, %v27_v10  ;;  %v1500_v25 = vld [vmem:[%s1998_s1 + $0x8] sm:$0xff]  ;;  %v135_v27 = vsel %vm116_vm0, %v90_v21, 0.0  ;;  %v31_v30 = vld [vmem:[%s1997_s0 + $0xa0] sm:$0xff]  ;;  %v33_v37 = vld [vmem:[%s1997_s0 + $0xb0] sm:$0xff] }
   0x6   :  { %v132_v18 = vsel %vm116_vm0, %v89_v15, 0.0  ;;  %1378 = vmatprep.subr.mxu0 %v1488_v22  ;;  %1404 = vmatprep.subr.mxu1 %v1500_v25  ;;  %v102_v28 = vmul.f32 %v29_v23, %v29_v23  ;;  %v101_v29 = vmul.f32 %v28_v24, %v28_v24  ;;  %v104_v34 = vmul.f32 %v31_v30, %v31_v30  ;;  %v32_v36 = vld [vmem:[%s1997_s0 + $0xa8] sm:$0xff]  ;;  %v34_v42 = vld [vmem:[%s1997_s0 + $0xb8] sm:$0xff]  ;;  %v19_v49 = vld [vmem:[%s1997_s0 + $0x40] sm:$0xff] }
   0x7   :  { %1379 = vmatpush3.msra.mxu0 %v1488_v22  ;;  %v165_v26 = vsel %vm116_vm0, %v100_v20, 0.0  ;;  %1405 = vmatpush3.msra.mxu1 %v1500_v25  ;;  %v103_v35 = vmul.f32 %v30_v31, %v30_v31  ;;  %v105_v40 = vmul.f32 %v32_v36, %v32_v36  ;;  %v106_v41 = vmul.f32 %v33_v37, %v33_v37  ;;  %v18_v43 = vld [vmem:[%s1997_s0 + $0x38] sm:$0xff]  ;;  %v35_v50 = vld [vmem:[%s1997_s0 + $0xc0] sm:$0xff]  ;;  %v20_v51 = vld [vmem:[%s1997_s0 + $0x48] sm:$0xff] }
   0x8   :  { %1381 = vmatmul.mubr.msk.f32.vlgmr.msra.gmra.mrb[0].mxu0 %vm116_vm0, %v12_v6  ;;  %1407 = vmatmul.mubr.msk.f32.vlgmr.msra.gmra.mrb[0].mxu1 %vm116_vm0, %v28_v24  ;;  %v171_v32 = vsel %vm116_vm0, %v102_v28, 0.0  ;;  %v168_v33 = vsel %vm116_vm0, %v101_v29, 0.0  ;;  %v177_v38 = vsel %vm116_vm0, %v104_v34, 0.0  ;;  %v107_v47 = vmul.f32 %v34_v42, %v34_v42  ;;  %v36_v54 = vld [vmem:[%s1997_s0 + $0xc8] sm:$0xff]  ;;  %v21_v57 = vld [vmem:[%s1997_s0 + $0x50] sm:$0xff]  ;;  %v22_v59 = vld [vmem:[%s1997_s0 + $0x58] sm:$0xff] }
   0x9   :  { %127 = vadd.xlane.f32.xlu1 %v126_v13  ;;  %121 = vadd.xlane.f32.xlu0 %v120_v14  ;;  %v174_v39 = vsel %vm116_vm0, %v103_v35, 0.0  ;;  %v180_v45 = vsel %vm116_vm0, %v105_v40, 0.0  ;;  %v183_v46 = vsel %vm116_vm0, %v106_v41, 0.0  ;;  %v91_v48 = vmul.f32 %v18_v43, %v18_v43  ;;  %v37_v58 = vld [vmem:[%s1997_s0 + $0xd0] sm:$0xff]  ;;  %v38_v62 = vld [vmem:[%s1997_s0 + $0xd8] sm:$0xff]  ;;  %v23_v1 = vld [vmem:[%s1997_s0 + $0x60] sm:$0xff] }
   0xa   :  { %1383 = vmatprep.mubr.msk.f32.mxu0 %vm116_vm0, %v13_v0  ;;  %1409 = vmatprep.mubr.msk.f32.mxu1 %vm116_vm0, %v29_v23  ;;  %v186_v52 = vsel %vm116_vm0, %v107_v47, 0.0  ;;  %v108_v53 = vmul.f32 %v35_v50, %v35_v50  ;;  %v92_v56 = vmul.f32 %v19_v49, %v19_v49  ;;  %v109_v61 = vmul.f32 %v36_v54, %v36_v54  ;;  %v24_v3 = vld [vmem:[%s1997_s0 + $0x68] sm:$0xff]  ;;  %v41_v10 = vld [vmem:[%s1997_s0 + $0xf0] sm:$0xff]  ;;  %v26_v11 = vld [vmem:[%s1997_s0 + $0x78] sm:$0xff] }
   0xb   :  { %v138_v55 = vsel %vm116_vm0, %v91_v48, 0.0  ;;  %v93_v0 = vmul.f32 %v20_v51, %v20_v51  ;;  %v110_v5 = vmul.f32 %v37_v58, %v37_v58  ;;  %v40_v7 = vld [vmem:[%s1997_s0 + $0xe8] sm:$0xff]  ;;  %v111_v13 = vmul.f32 %v38_v62, %v38_v62  ;;  %v42_v16 = vld [vmem:[%s1997_s0 + $0xf8] sm:$0xff] }
   0xc   :  { %1384 = vmatmul.mubr.msk.f32.gmra.mrb[2].mxu0 %vm116_vm0, %v14_v2  ;;  %1410 = vmatmul.mubr.msk.f32.gmra.mrb[2].mxu1 %vm116_vm0, %v30_v31  ;;  %v189_v60 = vsel %vm116_vm0, %v108_v53, 0.0  ;;  %v141_v63 = vsel %vm116_vm0, %v92_v56, 0.0  ;;  %v39_v2 = vld [vmem:[%s1997_s0 + $0xe0] sm:$0xff]  ;;  %v192_v4 = vsel %vm116_vm0, %v109_v61, 0.0  ;;  %v95_v15 = vmul.f32 %v22_v59, %v22_v59 }
   0xd   :  { %133 = vadd.xlane.f32.xlu1 %v132_v18  ;;  %130 = vadd.xlane.f32.xlu0 %v129_v19  ;;  %v144_v6 = vsel %vm116_vm0, %v93_v0, 0.0  ;;  %v195_v12 = vsel %vm116_vm0, %v110_v5, 0.0  ;;  %v112_v18 = vmul.f32 %v39_v2, %v39_v2  ;;  %v96_v20 = vmul.f32 %v23_v1, %v23_v1 }
   0xe   :  { %1386 = vmatprep.mubr.msk.f32.mxu0 %vm116_vm0, %v15_v9  ;;  %1412 = vmatprep.mubr.msk.f32.mxu1 %vm116_vm0, %v31_v30  ;;  %v25_v9 = vld [vmem:[%s1997_s0 + $0x70] sm:$0xff]  ;;  %v150_v19 = vsel %vm116_vm0, %v95_v15, 0.0  ;;  %v113_v23 = vmul.f32 %v40_v7, %v40_v7  ;;  %v114_v28 = vmul.f32 %v41_v10, %v41_v10  ;;  %v99_v34 = vmul.f32 %v26_v11, %v26_v11 }
   0xf   :  { %v201_v21 = vsel %vm116_vm0, %v112_v18, 0.0  ;;  %v153_v24 = vsel %vm116_vm0, %v96_v20, 0.0  ;;  %v98_v30 = vmul.f32 %v25_v9, %v25_v9 }
  0x10   :  { %1387 = vmatmul.mubr.msk.f32.gmra.mrb[4].mxu0 %vm116_vm0, %v16_v8  ;;  %1413 = vmatmul.mubr.msk.f32.gmra.mrb[4].mxu1 %vm116_vm0, %v32_v36  ;;  %v94_v8 = vmul.f32 %v21_v57, %v21_v57  ;;  %v207_v31 = vsel %vm116_vm0, %v114_v28, 0.0  ;;  %v162_v36 = vsel %vm116_vm0, %v99_v34, 0.0 }
  0x11   :  { %166 = vadd.xlane.f32.xlu1 %v165_v26  ;;  %136 = vadd.xlane.f32.xlu0 %v135_v27  ;;  %v97_v26 = vmul.f32 %v24_v3, %v24_v3  ;;  %v204_v27 = vsel %vm116_vm0, %v113_v23, 0.0 }
  0x12   :  { %1389 = vmatprep.mubr.msk.f32.mxu0 %vm116_vm0, %v17_v17  ;;  %1415 = vmatprep.mubr.msk.f32.mxu1 %vm116_vm0, %v33_v37  ;;  %v147_v14 = vsel %vm116_vm0, %v94_v8, 0.0  ;;  %v198_v17 = vsel %vm116_vm0, %v111_v13, 0.0 }
  0x13   :  { %v156_v29 = vsel %vm116_vm0, %v97_v26, 0.0 }
  0x14   :  { %1390 = vmatmul.mubr.msk.f32.gmra.mrb[6].mxu0 %vm116_vm0, %v18_v43  ;;  %1416 = vmatmul.mubr.msk.f32.gmra.mrb[6].mxu1 %vm116_vm0, %v34_v42 }
  0x15   :  { %172 = vadd.xlane.f32.xlu1 %v171_v32  ;;  %169 = vadd.xlane.f32.xlu0 %v168_v33  ;;  %v115_v32 = vmul.f32 %v42_v16, %v42_v16  ;;  %v159_v33 = vsel %vm116_vm0, %v98_v30, 0.0 }
  0x16   :  { %1392 = vmatprep.mubr.msk.f32.mxu0 %vm116_vm0, %v19_v49  ;;  %1418 = vmatprep.mubr.msk.f32.mxu1 %vm116_vm0, %v35_v50 }
  0x17   :  { %v210_v35 = vsel %vm116_vm0, %v115_v32, 0.0 }
  0x18   :  { %1393 = vmatmul.mubr.msk.f32.gmra.mrb[8].mxu0 %vm116_vm0, %v20_v51  ;;  %1419 = vmatmul.mubr.msk.f32.gmra.mrb[8].mxu1 %vm116_vm0, %v36_v54 }
  0x19   :  { %178 = vadd.xlane.f32.xlu1 %v177_v38  ;;  %175 = vadd.xlane.f32.xlu0 %v174_v39 }
  0x1a   :  { %1395 = vmatprep.mubr.msk.f32.mxu0 %vm116_vm0, %v21_v57  ;;  %1421 = vmatprep.mubr.msk.f32.mxu1 %vm116_vm0, %v37_v58 }
  0x1c   :  { %1396 = vmatmul.mubr.msk.f32.gmra.mrb[10].mxu0 %vm116_vm0, %v22_v59  ;;  %1422 = vmatmul.mubr.msk.f32.gmra.mrb[10].mxu1 %vm116_vm0, %v38_v62 }
  0x1d   :  { %181 = vadd.xlane.f32.xlu0 %v180_v45  ;;  %184 = vadd.xlane.f32.xlu1 %v183_v46 }
  0x1e   :  { %1398 = vmatprep.mubr.msk.f32.mxu0 %vm116_vm0, %v23_v1  ;;  %1424 = vmatprep.mubr.msk.f32.mxu1 %vm116_vm0, %v39_v2 }
  0x20   :  { %1399 = vmatmul.mubr.msk.f32.gmra.mrb[12].mxu0 %vm116_vm0, %v24_v3  ;;  %1425 = vmatmul.mubr.msk.f32.gmra.mrb[12].mxu1 %vm116_vm0, %v40_v7 }
  0x21   :  { %187 = vadd.xlane.f32.xlu1 %v186_v52  ;;  %139 = vadd.xlane.f32.xlu0 %v138_v55 }
  0x22   :  { %1401 = vmatprep.mubr.msk.f32.mxu0 %vm116_vm0, %v25_v9  ;;  %1427 = vmatprep.mubr.msk.f32.mxu1 %vm116_vm0, %v41_v10 }
  0x24   :  { %1402 = vmatmul.mubr.msk.f32.gmra.mrb[14].mxu0 %vm116_vm0, %v26_v11  ;;  %1428 = vmatmul.mubr.msk.f32.gmra.mrb[14].mxu1 %vm116_vm0, %v42_v16 }
  0x25   :  { %190 = vadd.xlane.f32.xlu1 %v189_v60  ;;  %142 = vadd.xlane.f32.xlu0 %v141_v63 }
  0x29   :  { %193 = vadd.xlane.f32.xlu1 %v192_v4  ;;  %145 = vadd.xlane.f32.xlu0 %v144_v6 }
  0x2d   :  { %196 = vadd.xlane.f32.xlu1 %v195_v12  ;;  %148 = vadd.xlane.f32.xlu0 %v147_v14 }
  0x31   :  { %199 = vadd.xlane.f32.xlu1 %v198_v17  ;;  %151 = vadd.xlane.f32.xlu0 %v150_v19 }
  0x35   :  { %202 = vadd.xlane.f32.xlu1 %v201_v21  ;;  %154 = vadd.xlane.f32.xlu0 %v153_v24 }
  0x39   :  { %205 = vadd.xlane.f32.xlu1 %v204_v27  ;;  %157 = vadd.xlane.f32.xlu0 %v156_v29 }
  0x3d   :  { %208 = vadd.xlane.f32.xlu1 %v207_v31  ;;  %160 = vadd.xlane.f32.xlu0 %v159_v33 }
  0x41   :  { %211 = vadd.xlane.f32.xlu1 %v210_v35  ;;  %163 = vadd.xlane.f32.xlu0 %v162_v36 }
  0x92   :  { %v125_v37 = vpop.xlane.xlu1 %124  ;;  %v119_v38 = vpop.xlane.xlu0 %118 }
  0x93   :  { %215 = vst.msk [vmem:[#allocation2 + $0x10] sm:$0xff] %vm51_vm1, %v125_v37  ;;  %213 = vst.msk [vmem:[#allocation2] sm:$0xff] %vm51_vm1, %v119_v38 }
  0x96   :  { %v128_v39 = vpop.xlane.xlu1 %127  ;;  %v122_v40 = vpop.xlane.xlu0 %121 }
  0x97   :  { %216 = vst.msk [vmem:[#allocation2 + $0x18] sm:$0xff] %vm51_vm1, %v128_v39  ;;  %214 = vst.msk [vmem:[#allocation2 + $0x8] sm:$0xff] %vm51_vm1, %v122_v40 }
  0x9a   :  { %v134_v41 = vpop.xlane.xlu1 %133  ;;  %v131_v42 = vpop.xlane.xlu0 %130  ;;  %v646_v43 = vld [vmem:[#allocation2] sm:$0xff]  ;;  %v648_v49 = vld [vmem:[#allocation2 + $0x10] sm:$0xff] }
  0x9b   :  { %218 = vst.msk [vmem:[#allocation2 + $0x28] sm:$0xff] %vm51_vm1, %v134_v41  ;;  %217 = vst.msk [vmem:[#allocation2 + $0x20] sm:$0xff] %vm51_vm1, %v131_v42  ;;  %680 = vperm.xlu0 %1433, %v646_v43  }
  0x9e   :  { %v167_v44 = vpop.xlane.xlu1 %166  ;;  %v137_v45 = vpop.xlane.xlu0 %136  ;;  %v647_v46 = vld [vmem:[#allocation2 + $0x8] sm:$0xff]  ;;  %v649_v60 = vld [vmem:[#allocation2 + $0x18] sm:$0xff] }
  0x9f   :  { %229 = vst.msk [vmem:[#allocation2 + $0x80] sm:$0xff] %vm51_vm1, %v167_v44  ;;  %219 = vst.msk [vmem:[#allocation2 + $0x30] sm:$0xff] %vm51_vm1, %v137_v45  ;;  %685 = vperm.xlu1 %1434, %v647_v46  }
  0xa2   :  { %v173_v47 = vpop.xlane.xlu1 %172  ;;  %v170_v48 = vpop.xlane.xlu0 %169  ;;  %v650_v5 = vld [vmem:[#allocation2 + $0x20] sm:$0xff]  ;;  %v651_v9 = vld [vmem:[#allocation2 + $0x28] sm:$0xff] }
  0xa3   :  { %231 = vst.msk [vmem:[#allocation2 + $0x90] sm:$0xff] %vm51_vm1, %v173_v47  ;;  %230 = vst.msk [vmem:[#allocation2 + $0x88] sm:$0xff] %vm51_vm1, %v170_v48  ;;  %690 = vperm.xlu1 %1434, %v648_v49  }
  0xa6   :  { %v179_v50 = vpop.xlane.xlu1 %178  ;;  %v176_v51 = vpop.xlane.xlu0 %175  ;;  %v662_v52 = vld [vmem:[#allocation2 + $0x80] sm:$0xff]  ;;  %v652_v13 = vld [vmem:[#allocation2 + $0x30] sm:$0xff] }
  0xa7   :  { %233 = vst.msk [vmem:[#allocation2 + $0xa0] sm:$0xff] %vm51_vm1, %v179_v50  ;;  %232 = vst.msk [vmem:[#allocation2 + $0x98] sm:$0xff] %vm51_vm1, %v176_v51  ;;  %760 = vperm.xlu1 %1434, %v662_v52  }
  0xaa   :  { %v182_v53 = vpop.xlane.xlu0 %181  ;;  %v663_v54 = vld [vmem:[#allocation2 + $0x88] sm:$0xff]  ;;  %v185_v55 = vpop.xlane.xlu1 %184  ;;  %v664_v56 = vld [vmem:[#allocation2 + $0x90] sm:$0xff] }
  0xab   :  { %234 = vst.msk [vmem:[#allocation2 + $0xa8] sm:$0xff] %vm51_vm1, %v182_v53  ;;  %765 = vperm.xlu1 %1434, %v663_v54   ;;  %235 = vst.msk [vmem:[#allocation2 + $0xb0] sm:$0xff] %vm51_vm1, %v185_v55 }
  0xae   :  { %v666_v57 = vld [vmem:[#allocation2 + $0xa0] sm:$0xff]  ;;  %v188_v58 = vpop.xlane.xlu1 %187  ;;  %v140_v59 = vpop.xlane.xlu0 %139  ;;  %v665_v0 = vld [vmem:[#allocation2 + $0x98] sm:$0xff] }
  0xaf   :  { %780 = vperm.xlu0 %1433, %v666_v57   ;;  %770 = vperm.xlu1 %1434, %v664_v56   ;;  %236 = vst.msk [vmem:[#allocation2 + $0xb8] sm:$0xff] %vm51_vm1, %v188_v58  ;;  %220 = vst.msk [vmem:[#allocation2 + $0x38] sm:$0xff] %vm51_vm1, %v140_v59 }
  0xb2   :  { %v667_v61 = vld [vmem:[#allocation2 + $0xa8] sm:$0xff]  ;;  %v191_v62 = vpop.xlane.xlu1 %190  ;;  %v143_v63 = vpop.xlane.xlu0 %142  ;;  %v668_v1 = vld [vmem:[#allocation2 + $0xb0] sm:$0xff] }
  0xb3   :  { %695 = vperm.xlu1 %1434, %v649_v60   ;;  %785 = vperm.xlu0 %1433, %v667_v61   ;;  %237 = vst.msk [vmem:[#allocation2 + $0xc0] sm:$0xff] %vm51_vm1, %v191_v62  ;;  %221 = vst.msk [vmem:[#allocation2 + $0x40] sm:$0xff] %vm51_vm1, %v143_v63 }
  0xb6   :  { %v194_v2 = vpop.xlane.xlu1 %193  ;;  %v146_v3 = vpop.xlane.xlu0 %145  ;;  %v669_v4 = vld [vmem:[#allocation2 + $0xb8] sm:$0xff] }
  0xb7   :  { %775 = vperm.xlu1 %1434, %v665_v0   ;;  %790 = vperm.xlu0 %1433, %v668_v1   ;;  %238 = vst.msk [vmem:[#allocation2 + $0xc8] sm:$0xff] %vm51_vm1, %v194_v2  ;;  %222 = vst.msk [vmem:[#allocation2 + $0x48] sm:$0xff] %vm51_vm1, %v146_v3  ;;  %v653_v17 = vld [vmem:[#allocation2 + $0x38] sm:$0xff] }
  0xba   :  { %v197_v6 = vpop.xlane.xlu1 %196  ;;  %v149_v7 = vpop.xlane.xlu0 %148  ;;  %v670_v8 = vld [vmem:[#allocation2 + $0xc0] sm:$0xff] }
  0xbb   :  { %700 = vperm.xlu1 %1434, %v650_v5   ;;  %795 = vperm.xlu0 %1433, %v669_v4   ;;  %239 = vst.msk [vmem:[#allocation2 + $0xd0] sm:$0xff] %vm51_vm1, %v197_v6  ;;  %223 = vst.msk [vmem:[#allocation2 + $0x50] sm:$0xff] %vm51_vm1, %v149_v7  ;;  %v654_v21 = vld [vmem:[#allocation2 + $0x40] sm:$0xff]  ;;  %v1436_v4 = vmov inf   ;;  %v632_v7 = vmul.f32 %v1488_v22, %v1488_v22 }
  0xbc   :  { %52 = vst.msk [vmem:[#allocation3] sm:$0xff] %vm51_vm1, %v1436_v4  ;;  %53 = vst.msk [vmem:[#allocation3 + $0x8] sm:$0xff] %vm51_vm1, %v1436_v4 }
  0xbd   :  { %54 = vst.msk [vmem:[#allocation3 + $0x10] sm:$0xff] %vm51_vm1, %v1436_v4  ;;  %55 = vst.msk [vmem:[#allocation3 + $0x18] sm:$0xff] %vm51_vm1, %v1436_v4 }
  0xbe   :  { %v200_v10 = vpop.xlane.xlu1 %199  ;;  %v152_v11 = vpop.xlane.xlu0 %151  ;;  %v671_v12 = vld [vmem:[#allocation2 + $0xc8] sm:$0xff]  ;;  %56 = vst.msk [vmem:[#allocation3 + $0x20] sm:$0xff] %vm51_vm1, %v1436_v4  ;;  %57 = vst.msk [vmem:[#allocation3 + $0x28] sm:$0xff] %vm51_vm1, %v1436_v4 }
  0xbf   :  { %705 = vperm.xlu1 %1434, %v651_v9   ;;  %800 = vperm.xlu0 %1433, %v670_v8   ;;  %240 = vst.msk [vmem:[#allocation2 + $0xd8] sm:$0xff] %vm51_vm1, %v200_v10  ;;  %224 = vst.msk [vmem:[#allocation2 + $0x58] sm:$0xff] %vm51_vm1, %v152_v11  ;;  %v655_v27 = vld [vmem:[#allocation2 + $0x48] sm:$0xff]  ;;  %v634_v9 = vrot.slane %v632_v7, 4 }
  0xc0   :  { %58 = vst.msk [vmem:[#allocation3 + $0x30] sm:$0xff] %vm51_vm1, %v1436_v4  ;;  %59 = vst.msk [vmem:[#allocation3 + $0x38] sm:$0xff] %vm51_vm1, %v1436_v4 }
  0xc1   :  { %60 = vst.msk [vmem:[#allocation3 + $0x40] sm:$0xff] %vm51_vm1, %v1436_v4  ;;  %61 = vst.msk [vmem:[#allocation3 + $0x48] sm:$0xff] %vm51_vm1, %v1436_v4  ;;  %v635_v10 = vadd.f32 %v634_v9, %v632_v7 }
  0xc2   :  { %v203_v14 = vpop.xlane.xlu1 %202  ;;  %v155_v15 = vpop.xlane.xlu0 %154  ;;  %v672_v16 = vld [vmem:[#allocation2 + $0xd0] sm:$0xff]  ;;  %62 = vst.msk [vmem:[#allocation3 + $0x50] sm:$0xff] %vm51_vm1, %v1436_v4  ;;  %63 = vst.msk [vmem:[#allocation3 + $0x58] sm:$0xff] %vm51_vm1, %v1436_v4 }
  0xc3   :  { %710 = vperm.xlu1 %1434, %v652_v13   ;;  %805 = vperm.xlu0 %1433, %v671_v12   ;;  %241 = vst.msk [vmem:[#allocation2 + $0xe0] sm:$0xff] %vm51_vm1, %v203_v14  ;;  %225 = vst.msk [vmem:[#allocation2 + $0x60] sm:$0xff] %vm51_vm1, %v155_v15  ;;  %v656_v31 = vld [vmem:[#allocation2 + $0x50] sm:$0xff]  ;;  %v636_v11 = vrot.slane %v635_v10, 2  ;;  %v633_v12 = vmul.f32 %v1500_v25, %v1500_v25 }
  0xc4   :  { %64 = vst.msk [vmem:[#allocation3 + $0x60] sm:$0xff] %vm51_vm1, %v1436_v4  ;;  %65 = vst.msk [vmem:[#allocation3 + $0x68] sm:$0xff] %vm51_vm1, %v1436_v4 }
  0xc5   :  { %66 = vst.msk [vmem:[#allocation3 + $0x70] sm:$0xff] %vm51_vm1, %v1436_v4  ;;  %67 = vst.msk [vmem:[#allocation3 + $0x78] sm:$0xff] %vm51_vm1, %v1436_v4  ;;  %v637_v13 = vadd.f32 %v636_v11, %v635_v10  ;;  %v640_v14 = vrot.slane %v633_v12, 4 }
  0xc6   :  { %v206_v18 = vpop.xlane.xlu1 %205  ;;  %v158_v19 = vpop.xlane.xlu0 %157  ;;  %v673_v20 = vld [vmem:[#allocation2 + $0xd8] sm:$0xff]  ;;  %68 = vst.msk [vmem:[#allocation3 + $0x80] sm:$0xff] %vm51_vm1, %v1436_v4  ;;  %69 = vst.msk [vmem:[#allocation3 + $0x88] sm:$0xff] %vm51_vm1, %v1436_v4 }
  0xc7   :  { %810 = vperm.xlu0 %1433, %v672_v16   ;;  %715 = vperm.xlu1 %1434, %v653_v17   ;;  %242 = vst.msk [vmem:[#allocation2 + $0xe8] sm:$0xff] %vm51_vm1, %v206_v18  ;;  %226 = vst.msk [vmem:[#allocation2 + $0x68] sm:$0xff] %vm51_vm1, %v158_v19  ;;  %v657_v33 = vld [vmem:[#allocation2 + $0x58] sm:$0xff]  ;;  %v638_v15 = vrot.slane %v637_v13, 1  ;;  %v641_v16 = vadd.f32 %v640_v14, %v633_v12  ;;  %v934_v17 = vlaneseq }
  0xc8   :  { %70 = vst.msk [vmem:[#allocation3 + $0x90] sm:$0xff] %vm51_vm1, %v1436_v4  ;;  %71 = vst.msk [vmem:[#allocation3 + $0x98] sm:$0xff] %vm51_vm1, %v1436_v4 }
  0xc9   :  { %72 = vst.msk [vmem:[#allocation3 + $0xa0] sm:$0xff] %vm51_vm1, %v1436_v4  ;;  %73 = vst.msk [vmem:[#allocation3 + $0xa8] sm:$0xff] %vm51_vm1, %v1436_v4  ;;  %v1759_v18 = vadd.f32 %v638_v15, %v637_v13  ;;  %v642_v19 = vrot.slane %v641_v16, 2 }
  0xca   :  { %v209_v23 = vpop.xlane.xlu1 %208  ;;  %v161_v24 = vpop.xlane.xlu0 %160  ;;  %v674_v26 = vld [vmem:[#allocation2 + $0xe0] sm:$0xff]  ;;  %74 = vst.msk [vmem:[#allocation3 + $0xb0] sm:$0xff] %vm51_vm1, %v1436_v4  ;;  %75 = vst.msk [vmem:[#allocation3 + $0xb8] sm:$0xff] %vm51_vm1, %v1436_v4 }
  0xcb   :  { %815 = vperm.xlu0 %1433, %v673_v20   ;;  %720 = vperm.xlu1 %1434, %v654_v21   ;;  %243 = vst.msk [vmem:[#allocation2 + $0xf0] sm:$0xff] %vm51_vm1, %v209_v23  ;;  %227 = vst.msk [vmem:[#allocation2 + $0x70] sm:$0xff] %vm51_vm1, %v161_v24  ;;  %v658_v35 = vld [vmem:[#allocation2 + $0x60] sm:$0xff]  ;;  %v1761_v20 = vand.u32 127, %v934_v17  ;;  %v643_v23 = vadd.f32 %v642_v19, %v641_v16 }
  0xcc   :  { %76 = vst.msk [vmem:[#allocation3 + $0xc0] sm:$0xff] %vm51_vm1, %v1436_v4  ;;  %77 = vst.msk [vmem:[#allocation3 + $0xc8] sm:$0xff] %vm51_vm1, %v1436_v4 }
  0xcd   :  { %78 = vst.msk [vmem:[#allocation3 + $0xd0] sm:$0xff] %vm51_vm1, %v1436_v4  ;;  %79 = vst.msk [vmem:[#allocation3 + $0xd8] sm:$0xff] %vm51_vm1, %v1436_v4  ;;  %vm939_vm2 = vcmp.lt.s32.totalorder %v1761_v20, 64  ;;  %v1047_v20 = vld [vmem:[#allocation3 + $0x80] sm:$0xff] }
  0xce   :  { %v212_v28 = vpop.xlane.xlu1 %211  ;;  %v164_v29 = vpop.xlane.xlu0 %163  ;;  %v675_v30 = vld [vmem:[#allocation2 + $0xe8] sm:$0xff]  ;;  %80 = vst.msk [vmem:[#allocation3 + $0xe0] sm:$0xff] %vm51_vm1, %v1436_v4  ;;  %81 = vst.msk [vmem:[#allocation3 + $0xe8] sm:$0xff] %vm51_vm1, %v1436_v4 }
  0xcf   :  { %820 = vperm.xlu0 %1433, %v674_v26   ;;  %725 = vperm.xlu1 %1434, %v655_v27   ;;  %244 = vst.msk [vmem:[#allocation2 + $0xf8] sm:$0xff] %vm51_vm1, %v212_v28  ;;  %228 = vst.msk [vmem:[#allocation2 + $0x78] sm:$0xff] %vm51_vm1, %v164_v29  ;;  %v659_v36 = vld [vmem:[#allocation2 + $0x68] sm:$0xff]  ;;  %v644_v28 = vrot.slane %v643_v23, 1 }
  0xd0   :  { %82 = vst.msk [vmem:[#allocation3 + $0xf0] sm:$0xff] %vm51_vm1, %v1436_v4  ;;  %83 = vst.msk [vmem:[#allocation3 + $0xf8] sm:$0xff] %vm51_vm1, %v1436_v4 }
  0xd2   :  { %v676_v32 = vld [vmem:[#allocation2 + $0xf0] sm:$0xff] }
  0xd3   :  { %825 = vperm.xlu0 %1433, %v675_v30   ;;  %730 = vperm.xlu1 %1434, %v656_v31   ;;  %v660_v37 = vld [vmem:[#allocation2 + $0x70] sm:$0xff] }
  0xd6   :  { %v677_v34 = vld [vmem:[#allocation2 + $0xf8] sm:$0xff] }
  0xd7   :  { %830 = vperm.xlu0 %1433, %v676_v32   ;;  %735 = vperm.xlu1 %1434, %v657_v33   ;;  %v661_v42 = vld [vmem:[#allocation2 + $0x78] sm:$0xff] }
  0xdb   :  { %835 = vperm.xlu0 %1433, %v677_v34   ;;  %740 = vperm.xlu1 %1434, %v658_v35   ;;  %v1659_v38 = vpop.f32.mrb[0].mxu0  ;;  %v1663_v40 = vpop.f32.mrb[0].mxu1  ;;  %v1776_v34 = vadd.f32 %v644_v28, %v643_v23 }
  0xdc   :  { %v1661_v39 = vpop.f32.mrb[1].mxu0  ;;  %v1665_v41 = vpop.f32.mrb[1].mxu1  ;;  %v871_v25 = vmul.f32 2.0, %v1659_v38  ;;  %v887_v4 = vmul.f32 2.0, %v1663_v40 }
  0xdd   :  { %v870_v22 = vmul.f32 2.0, %v1661_v39 }
  0xdf   :  { %745 = vperm.xlu1 %1434, %v659_v36   ;;  %v1667_v43 = vpop.f32.mrb[2].mxu0  ;;  %v1671_v45 = vpop.f32.mrb[2].mxu1 }
  0xe0   :  { %v1669_v44 = vpop.f32.mrb[3].mxu0  ;;  %v1673_v46 = vpop.f32.mrb[3].mxu1 }
  0xe1   :  { %v872_v31 = vmul.f32 2.0, %v1669_v44 }
  0xe3   :  { %750 = vperm.xlu1 %1434, %v660_v37   ;;  %v1675_v47 = vpop.f32.mrb[4].mxu0  ;;  %v1677_v48 = vpop.f32.mrb[4].mxu1  ;;  %v886_v37 = vmul.f32 2.0, %v1665_v41  ;;  %v888_v41 = vmul.f32 2.0, %v1673_v46  ;;  %v873_v46 = vmul.f32 2.0, %v1667_v43 }
  0xe4   :  { %v1679_v49 = vpop.f32.mrb[5].mxu0  ;;  %v1681_v50 = vpop.f32.mrb[5].mxu1 }
  0xe5   :  { %v890_v12 = vmul.f32 2.0, %v1681_v50  ;;  %v891_v50 = vmul.f32 2.0, %v1677_v48  ;;  %v889_v48 = vmul.f32 2.0, %v1671_v45 }
  0xe7   :  { %755 = vperm.xlu1 %1434, %v661_v42   ;;  %v1683_v51 = vpop.f32.mrb[6].mxu0  ;;  %v1685_v52 = vpop.f32.mrb[6].mxu1 }
  0xe8   :  { %v1687_v53 = vpop.f32.mrb[7].mxu0  ;;  %v1689_v54 = vpop.f32.mrb[7].mxu1 }
  0xeb   :  { %v1691_v55 = vpop.f32.mrb[8].mxu0  ;;  %v1693_v56 = vpop.f32.mrb[8].mxu1 }
  0xec   :  { %v1695_v57 = vpop.f32.mrb[9].mxu0  ;;  %v1697_v58 = vpop.f32.mrb[9].mxu1 }
  0xef   :  { %v1699_v59 = vpop.f32.mrb[10].mxu0  ;;  %v1701_v60 = vpop.f32.mrb[10].mxu1 }
  0xf0   :  { %v1703_v61 = vpop.f32.mrb[11].mxu0  ;;  %v1705_v62 = vpop.f32.mrb[11].mxu1 }
  0xf3   :  { %v1707_v63 = vpop.f32.mrb[12].mxu0  ;;  %v1709_v0 = vpop.f32.mrb[12].mxu1 }
  0xf4   :  { %v1711_v1 = vpop.f32.mrb[13].mxu0  ;;  %v1713_v2 = vpop.f32.mrb[13].mxu1 }
  0xf7   :  { %v1715_v3 = vpop.f32.mrb[14].mxu0  ;;  %v1749_v5 = vpop.f32.mrb[14].mxu1 }
  0xf8   :  { %v1751_v6 = vpop.f32.mrb[15].mxu0  ;;  %v1755_v8 = vpop.f32.mrb[15].mxu1 }
 0x11a   :  { %v681_v21 = vpop.permute.xlu0 %680 }
 0x11b   :  { %v838_v24 = vadd.f32 %v681_v21, %v1759_v18 }
 0x11d   :  { %v1767_v26 = vsub.f32 %v838_v24, %v870_v22 }
 0x11e   :  { %v686_v27 = vpop.permute.xlu1 %685 }
 0x11f   :  { %v839_v29 = vadd.f32 %v686_v27, %v1759_v18  ;;  %v999_v30 = vsel %vm939_vm2, %v1767_v26, inf }
 0x120   :  { %1063 = vmin.xlane.f32.xlu1 %v999_v30  ;;  %v892_v30 = vmul.f32 2.0, %v1689_v54  ;;  %v874_v54 = vmul.f32 2.0, %v1679_v49  ;;  %v875_v49 = vmul.f32 2.0, %v1675_v47  ;;  %v895_v47 = vmul.f32 2.0, %v1693_v56 }
 0x121   :  { %v1774_v32 = vsub.f32 %v839_v29, %v871_v25 }
 0x122   :  { %v691_v33 = vpop.permute.xlu1 %690 }
 0x123   :  { %v840_v35 = vadd.f32 %v691_v33, %v1759_v18  ;;  %v1000_v36 = vsel %vm939_vm2, %v1774_v32, inf }
 0x124   :  { %1065 = vmin.xlane.f32.xlu0 %v1000_v36 }
 0x125   :  { %v1783_v38 = vsub.f32 %v840_v35, %v872_v31 }
 0x126   :  { %v761_v39 = vpop.permute.xlu1 %760 }
 0x127   :  { %v854_v42 = vadd.f32 %v761_v39, %v1776_v34  ;;  %v940_v44 = vmin.f32 %v1767_v26, %v1783_v38  ;;  %v1001_v40 = vsel %vm939_vm2, %v1783_v38, inf }
 0x129   :  { %v918_v7 = vsub.f32 %v854_v42, %v886_v37 }
 0x12a   :  { %v766_v9 = vpop.permute.xlu1 %765 }
 0x12b   :  { %v855_v10 = vadd.f32 %v766_v9, %v1776_v34  ;;  %v1015_v11 = vsel %vm939_vm2, %v918_v7, inf }
 0x12c   :  { %1095 = vmin.xlane.f32.xlu0 %v1015_v11 }
 0x12d   :  { %v919_v13 = vsub.f32 %v855_v10, %v887_v4 }
 0x12e   :  { %v771_v14 = vpop.permute.xlu1 %770  ;;  %v781_v15 = vpop.permute.xlu0 %780 }
 0x12f   :  { %v856_v16 = vadd.f32 %v771_v14, %v1776_v34  ;;  %v858_v17 = vadd.f32 %v781_v15, %v1776_v34  ;;  %v1016_v19 = vsel %vm939_vm2, %v919_v13, inf }
 0x130   :  { %1067 = vmin.xlane.f32.xlu0 %v1001_v40  ;;  %1097 = vmin.xlane.f32.xlu1 %v1016_v19 }
 0x131   :  { %v920_v22 = vsub.f32 %v856_v16, %v888_v41  ;;  %v922_v21 = vsub.f32 %v858_v17, %v890_v12  ;;  %v894_v16 = vmul.f32 2.0, %v1697_v58 }
 0x132   :  { %v696_v23 = vpop.permute.xlu1 %695  ;;  %v786_v24 = vpop.permute.xlu0 %785 }
 0x133   :  { %v841_v25 = vadd.f32 %v696_v23, %v1759_v18  ;;  %v859_v27 = vadd.f32 %v786_v24, %v1776_v34  ;;  %v961_v28 = vmin.f32 %v918_v7, %v920_v22  ;;  %v1017_v29 = vsel %vm939_vm2, %v920_v22, inf }
 0x134   :  { %1099 = vmin.xlane.f32.xlu1 %v1017_v29  ;;  %v893_v7 = vmul.f32 2.0, %v1685_v52 }
 0x135   :  { %v905_v31 = vsub.f32 %v841_v25, %v873_v46  ;;  %v963_v33 = vmin.f32 %v961_v28, %v922_v21  ;;  %v923_v43 = vsub.f32 %v859_v27, %v891_v50  ;;  %v1019_v50 = vsel %vm939_vm2, %v922_v21, inf }
 0x136   :  { %v776_v35 = vpop.permute.xlu1 %775  ;;  %v791_v36 = vpop.permute.xlu0 %790  ;;  %v876_v25 = vmul.f32 2.0, %v1687_v53  ;;  %v896_v53 = vmul.f32 2.0, %v1705_v62 }
 0x137   :  { %v857_v37 = vadd.f32 %v776_v35, %v1776_v34  ;;  %v860_v39 = vadd.f32 %v791_v36, %v1776_v34  ;;  %v941_v42 = vmin.f32 %v1774_v32, %v905_v31  ;;  %v1002_v4 = vsel %vm939_vm2, %v905_v31, inf }
 0x138   :  { %1069 = vmin.xlane.f32.xlu0 %v1002_v4  ;;  %v877_v35 = vmul.f32 2.0, %v1683_v51  ;;  %v878_v51 = vmul.f32 2.0, %v1695_v57  ;;  %v898_v57 = vmul.f32 2.0, %v1713_v2 }
 0x139   :  { %v921_v9 = vsub.f32 %v857_v37, %v889_v48  ;;  %v924_v10 = vsub.f32 %v860_v39, %v892_v30  ;;  %v1020_v30 = vsel %vm939_vm2, %v923_v43, inf }
 0x13a   :  { %v701_v11 = vpop.permute.xlu1 %700  ;;  %v796_v45 = vpop.permute.xlu0 %795 }
 0x13b   :  { %v842_v41 = vadd.f32 %v701_v11, %v1759_v18  ;;  %v861_v12 = vadd.f32 %v796_v45, %v1776_v34  ;;  %v962_v14 = vmin.f32 %v919_v13, %v921_v9  ;;  %v1018_v32 = vsel %vm939_vm2, %v921_v9, inf }
 0x13c   :  { %1101 = vmin.xlane.f32.xlu1 %v1018_v32  ;;  %v965_v15 = vmin.f32 %v963_v33, %v924_v10 }
 0x13d   :  { %v906_v17 = vsub.f32 %v842_v41, %v874_v54  ;;  %v964_v52 = vmin.f32 %v962_v14, %v923_v43  ;;  %v925_v40 = vsub.f32 %v861_v12, %v893_v7  ;;  %v1021_v43 = vsel %vm939_vm2, %v924_v10, inf }
 0x13e   :  { %v706_v19 = vpop.permute.xlu1 %705  ;;  %v801_v46 = vpop.permute.xlu0 %800  ;;  %v897_v54 = vmul.f32 2.0, %v1701_v60 }
 0x13f   :  { %v843_v22 = vadd.f32 %v706_v19, %v1759_v18  ;;  %v862_v13 = vadd.f32 %v801_v46, %v1776_v34  ;;  %v1003_v23 = vsel %vm939_vm2, %v906_v17, inf  ;;  %v942_v58 = vmin.f32 %v940_v44, %v906_v17 }
 0x140   :  { %1071 = vmin.xlane.f32.xlu0 %v1003_v23  ;;  %1103 = vmin.xlane.f32.xlu1 %v1019_v50  ;;  %v966_v24 = vmin.f32 %v964_v52, %v925_v40  ;;  %v1022_v10 = vsel %vm939_vm2, %v925_v40, inf  ;;  %v879_v52 = vmul.f32 2.0, %v1691_v55  ;;  %v899_v23 = vmul.f32 2.0, %v1709_v0 }
 0x141   :  { %v907_v27 = vsub.f32 %v843_v22, %v875_v49  ;;  %v926_v21 = vsub.f32 %v862_v13, %v894_v16  ;;  %v880_v55 = vmul.f32 2.0, %v1703_v61  ;;  %v900_v61 = vmul.f32 2.0, %v1755_v8 }
 0x142   :  { %v711_v28 = vpop.permute.xlu1 %710  ;;  %v806_v29 = vpop.permute.xlu0 %805 }
 0x143   :  { %v844_v31 = vadd.f32 %v711_v28, %v1759_v18  ;;  %v863_v33 = vadd.f32 %v806_v29, %v1776_v34  ;;  %v943_v26 = vmin.f32 %v941_v42, %v907_v27  ;;  %v1004_v38 = vsel %vm939_vm2, %v907_v27, inf }
 0x144   :  { %1073 = vmin.xlane.f32.xlu0 %v1004_v38  ;;  %1105 = vmin.xlane.f32.xlu1 %v1020_v30  ;;  %v967_v56 = vmin.f32 %v965_v15, %v926_v21  ;;  %v1023_v40 = vsel %vm939_vm2, %v926_v21, inf }
 0x145   :  { %v908_v44 = vsub.f32 %v844_v31, %v876_v25  ;;  %v927_v48 = vsub.f32 %v863_v33, %v895_v47 }
 0x146   :  { %v716_v36 = vpop.permute.xlu1 %715  ;;  %v811_v37 = vpop.permute.xlu0 %810 }
 0x147   :  { %v845_v39 = vadd.f32 %v716_v36, %v1759_v18  ;;  %v864_v42 = vadd.f32 %v811_v37, %v1776_v34  ;;  %v1005_v4 = vsel %vm939_vm2, %v908_v44, inf  ;;  %v944_v7 = vmin.f32 %v942_v58, %v908_v44 }
 0x148   :  { %1075 = vmin.xlane.f32.xlu0 %v1005_v4  ;;  %1107 = vmin.xlane.f32.xlu1 %v1021_v43  ;;  %v968_v62 = vmin.f32 %v966_v24, %v927_v48  ;;  %v1024_v27 = vsel %vm939_vm2, %v927_v48, inf  ;;  %v901_v37 = vmul.f32 2.0, %v1749_v5 }
 0x149   :  { %v909_v9 = vsub.f32 %v845_v39, %v877_v35  ;;  %v928_v11 = vsub.f32 %v864_v42, %v896_v53 }
 0x14a   :  { %v721_v45 = vpop.permute.xlu1 %720  ;;  %v816_v41 = vpop.permute.xlu0 %815 }
 0x14b   :  { %v846_v12 = vadd.f32 %v721_v45, %v1759_v18  ;;  %v865_v14 = vadd.f32 %v816_v41, %v1776_v34  ;;  %v1006_v32 = vsel %vm939_vm2, %v909_v9, inf  ;;  %v945_v15 = vmin.f32 %v943_v26, %v909_v9 }
 0x14c   :  { %1077 = vmin.xlane.f32.xlu0 %v1006_v32  ;;  %1109 = vmin.xlane.f32.xlu1 %v1022_v10  ;;  %v969_v60 = vmin.f32 %v967_v56, %v928_v11  ;;  %v881_v26 = vmul.f32 2.0, %v1699_v59  ;;  %v1025_v53 = vsel %vm939_vm2, %v928_v11, inf  ;;  %v882_v59 = vmul.f32 2.0, %v1711_v1 }
 0x14d   :  { %v910_v16 = vsub.f32 %v846_v12, %v878_v51  ;;  %v929_v17 = vsub.f32 %v865_v14, %v897_v54  ;;  %v883_v1 = vmul.f32 2.0, %v1707_v63 }
 0x14e   :  { %v726_v49 = vpop.permute.xlu1 %725  ;;  %v821_v19 = vpop.permute.xlu0 %820 }
 0x14f   :  { %v847_v46 = vadd.f32 %v726_v49, %v1759_v18  ;;  %v866_v50 = vadd.f32 %v821_v19, %v1776_v34  ;;  %v1007_v22 = vsel %vm939_vm2, %v910_v16, inf  ;;  %v946_v13 = vmin.f32 %v944_v7, %v910_v16 }
 0x150   :  { %1079 = vmin.xlane.f32.xlu0 %v1007_v22  ;;  %1111 = vmin.xlane.f32.xlu1 %v1023_v40  ;;  %v970_v2 = vmin.f32 %v968_v62, %v929_v17  ;;  %v1026_v7 = vsel %vm939_vm2, %v929_v17, inf }
 0x151   :  { %v911_v58 = vsub.f32 %v847_v46, %v879_v52  ;;  %v930_v24 = vsub.f32 %v866_v50, %v898_v57  ;;  %v885_v50 = vmul.f32 2.0, %v1715_v3 }
 0x152   :  { %v731_v47 = vpop.permute.xlu1 %730  ;;  %v826_v25 = vpop.permute.xlu0 %825 }
 0x153   :  { %v848_v21 = vadd.f32 %v731_v47, %v1759_v18  ;;  %v867_v28 = vadd.f32 %v826_v25, %v1776_v34  ;;  %v1008_v29 = vsel %vm939_vm2, %v911_v58, inf  ;;  %v947_v30 = vmin.f32 %v945_v15, %v911_v58 }
 0x154   :  { %1081 = vmin.xlane.f32.xlu0 %v1008_v29  ;;  %1113 = vmin.xlane.f32.xlu1 %v1024_v27  ;;  %v971_v0 = vmin.f32 %v969_v60, %v930_v24  ;;  %v1027_v10 = vsel %vm939_vm2, %v930_v24, inf  ;;  %v884_v15 = vmul.f32 2.0, %v1751_v6 }
 0x155   :  { %v912_v31 = vsub.f32 %v848_v21, %v880_v55  ;;  %v931_v33 = vsub.f32 %v867_v28, %v899_v23 }
 0x156   :  { %v736_v38 = vpop.permute.xlu1 %735  ;;  %v831_v56 = vpop.permute.xlu0 %830 }
 0x157   :  { %v849_v44 = vadd.f32 %v736_v38, %v1759_v18  ;;  %v868_v48 = vadd.f32 %v831_v56, %v1776_v34  ;;  %v1009_v35 = vsel %vm939_vm2, %v912_v31, inf  ;;  %v948_v36 = vmin.f32 %v946_v13, %v912_v31  ;;  %v1031_v56 = vld [vmem:[#allocation3] sm:$0xff] }
 0x158   :  { %1083 = vmin.xlane.f32.xlu0 %v1009_v35  ;;  %1115 = vmin.xlane.f32.xlu1 %v1025_v53  ;;  %v972_v8 = vmin.f32 %v970_v2, %v931_v33  ;;  %v1028_v63 = vsel %vm939_vm2, %v931_v33, inf  ;;  %v1437_v38 = vmov 0.0  }
 0x159   :  { %v932_v43 = vsub.f32 %v868_v48, %v900_v61  ;;  %v913_v39 = vsub.f32 %v849_v44, %v881_v26  ;;  %50 = vst.msk [vmem:[%s1999_s2] sm:$0x3] %vm49_vm3, %v1437_v38  ;;  %v1032_v48 = vld [vmem:[#allocation3 + $0x8] sm:$0xff]  ;;  %v1041_v38 = vld [vmem:[#allocation3 + $0x50] sm:$0xff] }
 0x15a   :  { %v741_v42 = vpop.permute.xlu1 %740  ;;  %v836_v4 = vpop.permute.xlu0 %835 }
 0x15b   :  { %v850_v62 = vadd.f32 %v741_v42, %v1759_v18  ;;  %v869_v54 = vadd.f32 %v836_v4, %v1776_v34  ;;  %v1010_v51 = vsel %vm939_vm2, %v913_v39, inf  ;;  %v949_v9 = vmin.f32 %v947_v30, %v913_v39 }
 0x15c   :  { %1085 = vmin.xlane.f32.xlu0 %v1010_v51  ;;  %1117 = vmin.xlane.f32.xlu1 %v1026_v7  ;;  %v973_v5 = vmin.f32 %v971_v0, %v932_v43  ;;  %v1029_v22 = vsel %vm939_vm2, %v932_v43, inf  ;;  %v1048_v43 = vld [vmem:[#allocation3 + $0x88] sm:$0xff] }
 0x15d   :  { %v933_v11 = vsub.f32 %v869_v54, %v901_v37  ;;  %v914_v45 = vsub.f32 %v850_v62, %v882_v59  ;;  %v1033_v59 = vld [vmem:[#allocation3 + $0x10] sm:$0xff] }
 0x15e   :  { %v746_v41 = vpop.permute.xlu1 %745  ;;  %v1049_v62 = vld [vmem:[#allocation3 + $0x90] sm:$0xff] }
 0x15f   :  { %v851_v12 = vadd.f32 %v746_v41, %v1759_v18  ;;  %v1011_v34 = vsel %vm939_vm2, %v914_v45, inf  ;;  %v950_v14 = vmin.f32 %v948_v36, %v914_v45  ;;  %v974_v32 = vmin.f32 %v972_v8, %v933_v11  ;;  %v1050_v45 = vld [vmem:[#allocation3 + $0x98] sm:$0xff] }
 0x160   :  { %1087 = vmin.xlane.f32.xlu0 %v1011_v34  ;;  %1119 = vmin.xlane.f32.xlu1 %v1027_v10  ;;  %v1030_v3 = vsel %vm939_vm2, %v933_v11, inf  ;;  %v1051_v10 = vld [vmem:[#allocation3 + $0xa0] sm:$0xff] }
 0x161   :  { %v915_v60 = vsub.f32 %v851_v12, %v883_v1  ;;  %v975_v57 = vmin.f32 %v973_v5, %v974_v32  ;;  %v1035_v12 = vld [vmem:[#allocation3 + $0x20] sm:$0xff] }
 0x162   :  { %v751_v16 = vpop.permute.xlu1 %750 }
 0x163   :  { %v852_v17 = vadd.f32 %v751_v16, %v1759_v18  ;;  %v1012_v52 = vsel %vm939_vm2, %v915_v60, inf  ;;  %v951_v49 = vmin.f32 %v949_v9, %v915_v60  ;;  %v976_v19 = vrot.slane %v975_v57, 4  ;;  %v1034_v9 = vld [vmem:[#allocation3 + $0x18] sm:$0xff]  ;;  %v1052_v60 = vld [vmem:[#allocation3 + $0xa8] sm:$0xff] }
 0x164   :  { %1089 = vmin.xlane.f32.xlu0 %v1012_v52  ;;  %1121 = vmin.xlane.f32.xlu1 %v1028_v63 }
 0x165   :  { %v916_v40 = vsub.f32 %v852_v17, %v884_v15  ;;  %v977_v46 = vmin.f32 %v975_v57, %v976_v19  ;;  %v1036_v57 = vld [vmem:[#allocation3 + $0x28] sm:$0xff]  ;;  %v1037_v19 = vld [vmem:[#allocation3 + $0x30] sm:$0xff] }
 0x166   :  { %v756_v6 = vpop.permute.xlu1 %755 }
 0x167   :  { %v853_v13 = vadd.f32 %v756_v6, %v1759_v18  ;;  %v1013_v2 = vsel %vm939_vm2, %v916_v40, inf  ;;  %v952_v23 = vmin.f32 %v950_v14, %v916_v40  ;;  %v978_v55 = vrot.slane %v977_v46, 2 }
 0x168   :  { %1091 = vmin.xlane.f32.xlu0 %v1013_v2  ;;  %1123 = vmin.xlane.f32.xlu1 %v1029_v22  ;;  %v1054_v22 = vld [vmem:[#allocation3 + $0xb8] sm:$0xff] }
 0x169   :  { %v917_v58 = vsub.f32 %v853_v13, %v885_v50  ;;  %v979_v24 = vmin.f32 %v977_v46, %v978_v55  ;;  %v1038_v13 = vld [vmem:[#allocation3 + $0x38] sm:$0xff] }
 0x16b   :  { %v1014_v47 = vsel %vm939_vm2, %v917_v58, inf  ;;  %v953_v25 = vmin.f32 %v951_v49, %v917_v58  ;;  %v980_v27 = vrot.slane %v979_v24, 1  ;;  %v1053_v49 = vld [vmem:[#allocation3 + $0xb0] sm:$0xff] }
 0x16c   :  { %1093 = vmin.xlane.f32.xlu0 %v1014_v47  ;;  %1125 = vmin.xlane.f32.xlu1 %v1030_v3  ;;  %v1039_v47 = vld [vmem:[#allocation3 + $0x40] sm:$0xff] }
 0x16d   :  { %v954_v18 = vmin.f32 %v952_v23, %v953_v25  ;;  %v981_v21 = vmin.f32 %v979_v24, %v980_v27  ;;  %v1055_v24 = vld [vmem:[#allocation3 + $0xc0] sm:$0xff] }
 0x16f   :  { %v983_v28 = vsel %vm939_vm2, %v981_v21, 0.0  ;;  %v955_v29 = vrot.slane %v954_v18, 4  ;;  %v1056_v21 = vld [vmem:[#allocation3 + $0xc8] sm:$0xff] }
 0x170   :  { %987 = vadd.xlane.f32.xlu1 %v983_v28  ;;  %v1040_v28 = vld [vmem:[#allocation3 + $0x48] sm:$0xff] }
 0x171   :  { %v956_v30 = vmin.f32 %v954_v18, %v955_v29 }
 0x173   :  { %v957_v0 = vrot.slane %v956_v30, 2 }
 0x175   :  { %v958_v61 = vmin.f32 %v956_v30, %v957_v0 }
 0x177   :  { %v959_v31 = vrot.slane %v958_v61, 1 }
 0x179   :  { %v960_v33 = vmin.f32 %v958_v61, %v959_v31  ;;  %v1057_v31 = vld [vmem:[#allocation3 + $0xd0] sm:$0xff] }
 0x17b   :  { %v982_v26 = vsel %vm939_vm2, %v960_v33, 0.0 }
 0x17c   :  { %985 = vadd.xlane.f32.xlu0 %v982_v26 }
 0x1ad   :  { %v1064_v53 = vpop.xlane.xlu1 %1063 }
 0x1ae   :  { %v1127_v44 = vmin.f32 %v1031_v56, %v1064_v53 }
 0x1b0   :  { %1160 = vst.msk [vmem:[#allocation3] sm:$0xff] %vm51_vm1, %v1127_v44 }
 0x1b1   :  { %v1066_v35 = vpop.xlane.xlu0 %1065 }
 0x1b2   :  { %v1128_v36 = vmin.f32 %v1032_v48, %v1066_v35 }
 0x1b4   :  { %1161 = vst.msk [vmem:[#allocation3 + $0x8] sm:$0xff] %vm51_vm1, %v1128_v36 }
 0x1b7   :  { %v1196_v56 = vld [vmem:[#allocation3] sm:$0xff] }
 0x1b9   :  { %v1096_v8 = vpop.xlane.xlu0 %1095 }
 0x1ba   :  { %v1143_v37 = vmin.f32 %v1047_v20, %v1096_v8 }
 0x1bb   :  { %v1197_v33 = vld [vmem:[#allocation3 + $0x8] sm:$0xff] }
 0x1bc   :  { %1176 = vst.msk [vmem:[#allocation3 + $0x80] sm:$0xff] %vm51_vm1, %v1143_v37  ;;  %v1229_v20 = vsel %vm51_vm1, %v1197_v33, 0.0 }
 0x1bd   :  { %v1098_v39 = vpop.xlane.xlu1 %1097  ;;  %v1068_v42 = vpop.xlane.xlu0 %1067 }
 0x1be   :  { %v1144_v4 = vmin.f32 %v1048_v43, %v1098_v39  ;;  %v1129_v7 = vmin.f32 %v1033_v59, %v1068_v42  ;;  %v1058_v59 = vld [vmem:[#allocation3 + $0xd8] sm:$0xff] }
 0x1c0   :  { %1177 = vst.msk [vmem:[#allocation3 + $0x88] sm:$0xff] %vm51_vm1, %v1144_v4  ;;  %1162 = vst.msk [vmem:[#allocation3 + $0x10] sm:$0xff] %vm51_vm1, %v1129_v7  ;;  %v1042_v4 = vld [vmem:[#allocation3 + $0x58] sm:$0xff]  ;;  %v1228_v7 = vsel %vm51_vm1, %v1196_v56, 0.0 }
 0x1c1   :  { %v1100_v54 = vpop.xlane.xlu1 %1099 }
 0x1c2   :  { %v1145_v51 = vmin.f32 %v1049_v62, %v1100_v54 }
 0x1c3   :  { %v1212_v53 = vld [vmem:[#allocation3 + $0x80] sm:$0xff] }
 0x1c4   :  { %1178 = vst.msk [vmem:[#allocation3 + $0x90] sm:$0xff] %vm51_vm1, %v1145_v51  ;;  %v1265_v62 = vsel %vm51_vm1, %v1212_v53, 0.0  ;;  %v1045_v53 = vld [vmem:[#allocation3 + $0x70] sm:$0xff] }
 0x1c5   :  { %v1070_v5 = vpop.xlane.xlu0 %1069 }
 0x1c6   :  { %v1130_v11 = vmin.f32 %v1034_v9, %v1070_v5  ;;  %v1230_v9 = vadd.f32 %v1229_v20, %v1228_v7 }
 0x1c7   :  { %v1213_v26 = vld [vmem:[#allocation3 + $0x88] sm:$0xff]  ;;  %v1198_v44 = vld [vmem:[#allocation3 + $0x10] sm:$0xff] }
 0x1c8   :  { %1163 = vst.msk [vmem:[#allocation3 + $0x18] sm:$0xff] %vm51_vm1, %v1130_v11  ;;  %v1266_v8 = vsel %vm51_vm1, %v1213_v26, 0.0  ;;  %v1231_v54 = vsel %vm51_vm1, %v1198_v44, 0.0  ;;  %v1061_v26 = vld [vmem:[#allocation3 + $0xf0] sm:$0xff] }
 0x1c9   :  { %v1102_v1 = vpop.xlane.xlu1 %1101  ;;  %v1267_v5 = vadd.f32 %v1266_v8, %v1265_v62 }
 0x1ca   :  { %v1146_v41 = vmin.f32 %v1050_v45, %v1102_v1 }
 0x1cb   :  { %v1214_v48 = vld [vmem:[#allocation3 + $0x90] sm:$0xff] }
 0x1cc   :  { %1179 = vst.msk [vmem:[#allocation3 + $0x98] sm:$0xff] %vm51_vm1, %v1146_v41  ;;  %v1268_v51 = vsel %vm51_vm1, %v1214_v48, 0.0 }
 0x1cd   :  { %v1104_v34 = vpop.xlane.xlu1 %1103  ;;  %v1072_v14 = vpop.xlane.xlu0 %1071 }
 0x1ce   :  { %v1147_v32 = vmin.f32 %v1051_v10, %v1104_v34  ;;  %v1131_v15 = vmin.f32 %v1035_v12, %v1072_v14 }
 0x1cf   :  { %v1199_v39 = vld [vmem:[#allocation3 + $0x18] sm:$0xff] }
 0x1d0   :  { %1180 = vst.msk [vmem:[#allocation3 + $0xa0] sm:$0xff] %vm51_vm1, %v1147_v32  ;;  %1164 = vst.msk [vmem:[#allocation3 + $0x20] sm:$0xff] %vm51_vm1, %v1131_v15  ;;  %v1233_v10 = vsel %vm51_vm1, %v1199_v39, 0.0  ;;  %v1059_v32 = vld [vmem:[#allocation3 + $0xe0] sm:$0xff]  ;;  %v1232_v15 = vadd.f32 %v1231_v54, %v1230_v9  ;;  %v1062_v54 = vld [vmem:[#allocation3 + $0xf8] sm:$0xff] }
 0x1d1   :  { %v1106_v16 = vpop.xlane.xlu1 %1105  ;;  %v1074_v63 = vpop.xlane.xlu0 %1073 }
 0x1d2   :  { %v1148_v17 = vmin.f32 %v1052_v60, %v1106_v16  ;;  %v1132_v52 = vmin.f32 %v1036_v57, %v1074_v63  ;;  %v1269_v60 = vadd.f32 %v1268_v51, %v1267_v5  ;;  %v1043_v63 = vld [vmem:[#allocation3 + $0x60] sm:$0xff]  ;;  %v1046_v5 = vld [vmem:[#allocation3 + $0x78] sm:$0xff] }
 0x1d3   :  { %v1215_v42 = vld [vmem:[#allocation3 + $0x98] sm:$0xff] }
 0x1d4   :  { %1181 = vst.msk [vmem:[#allocation3 + $0xa8] sm:$0xff] %vm51_vm1, %v1148_v17  ;;  %1165 = vst.msk [vmem:[#allocation3 + $0x28] sm:$0xff] %vm51_vm1, %v1132_v52  ;;  %v1270_v12 = vsel %vm51_vm1, %v1215_v42, 0.0 }
 0x1d5   :  { %v1108_v40 = vpop.xlane.xlu1 %1107  ;;  %v1076_v46 = vpop.xlane.xlu0 %1075 }
 0x1d6   :  { %v1149_v50 = vmin.f32 %v1053_v49, %v1108_v40  ;;  %v1133_v6 = vmin.f32 %v1037_v19, %v1076_v46  ;;  %v1234_v49 = vadd.f32 %v1233_v10, %v1232_v15  ;;  %v1271_v19 = vadd.f32 %v1270_v12, %v1269_v60 }
 0x1d7   :  { %v1216_v11 = vld [vmem:[#allocation3 + $0xa0] sm:$0xff] }
 0x1d8   :  { %1182 = vst.msk [vmem:[#allocation3 + $0xb0] sm:$0xff] %vm51_vm1, %v1149_v50  ;;  %1166 = vst.msk [vmem:[#allocation3 + $0x30] sm:$0xff] %vm51_vm1, %v1133_v6  ;;  %v1200_v45 = vld [vmem:[#allocation3 + $0x20] sm:$0xff]  ;;  %v1272_v17 = vsel %vm51_vm1, %v1216_v11, 0.0 }
 0x1d9   :  { %v1110_v2 = vpop.xlane.xlu1 %1109  ;;  %v1078_v23 = vpop.xlane.xlu0 %1077  ;;  %v1235_v52 = vsel %vm51_vm1, %v1200_v45, 0.0 }
 0x1da   :  { %v1150_v55 = vmin.f32 %v1054_v22, %v1110_v2  ;;  %v1134_v58 = vmin.f32 %v1038_v13, %v1078_v23  ;;  %v1060_v2 = vld [vmem:[#allocation3 + $0xe8] sm:$0xff] }
 0x1db   :  { %v1217_v57 = vld [vmem:[#allocation3 + $0xa8] sm:$0xff] }
 0x1dc   :  { %1183 = vst.msk [vmem:[#allocation3 + $0xb8] sm:$0xff] %vm51_vm1, %v1150_v55  ;;  %1167 = vst.msk [vmem:[#allocation3 + $0x38] sm:$0xff] %vm51_vm1, %v1134_v58  ;;  %v1201_v16 = vld [vmem:[#allocation3 + $0x28] sm:$0xff]  ;;  %v1274_v55 = vsel %vm51_vm1, %v1217_v57, 0.0 }
 0x1dd   :  { %v1112_v25 = vpop.xlane.xlu1 %1111  ;;  %v1080_v3 = vpop.xlane.xlu0 %1079  ;;  %v1237_v23 = vsel %vm51_vm1, %v1201_v16, 0.0  ;;  %v1044_v58 = vld [vmem:[#allocation3 + $0x68] sm:$0xff] }
 0x1de   :  { %v1151_v27 = vmin.f32 %v1055_v24, %v1112_v25  ;;  %v1135_v18 = vmin.f32 %v1039_v47, %v1080_v3  ;;  %v1236_v25 = vadd.f32 %v1235_v52, %v1234_v49  ;;  %v1273_v3 = vadd.f32 %v1272_v17, %v1271_v19 }
 0x1df   :  { %v1202_v50 = vld [vmem:[#allocation3 + $0x30] sm:$0xff] }
 0x1e0   :  { %1184 = vst.msk [vmem:[#allocation3 + $0xc0] sm:$0xff] %vm51_vm1, %v1151_v27  ;;  %1168 = vst.msk [vmem:[#allocation3 + $0x40] sm:$0xff] %vm51_vm1, %v1135_v18  ;;  %v1218_v6 = vld [vmem:[#allocation3 + $0xb0] sm:$0xff]  ;;  %v1239_v27 = vsel %vm51_vm1, %v1202_v50, 0.0 }
 0x1e1   :  { %v1114_v29 = vpop.xlane.xlu1 %1113  ;;  %v1082_v30 = vpop.xlane.xlu0 %1081  ;;  %v1276_v18 = vsel %vm51_vm1, %v1218_v6, 0.0 }
 0x1e2   :  { %v1152_v0 = vmin.f32 %v1056_v21, %v1114_v29  ;;  %v1136_v61 = vmin.f32 %v1040_v28, %v1082_v30 }
 0x1e3   :  { %v1203_v24 = vld [vmem:[#allocation3 + $0x38] sm:$0xff] }
 0x1e4   :  { %1185 = vst.msk [vmem:[#allocation3 + $0xc8] sm:$0xff] %vm51_vm1, %v1152_v0  ;;  %1169 = vst.msk [vmem:[#allocation3 + $0x48] sm:$0xff] %vm51_vm1, %v1136_v61  ;;  %v1219_v47 = vld [vmem:[#allocation3 + $0xb8] sm:$0xff]  ;;  %v1238_v0 = vadd.f32 %v1237_v23, %v1236_v25  ;;  %v1275_v61 = vadd.f32 %v1274_v55, %v1273_v3 }
 0x1e5   :  { %v1116_v35 = vpop.xlane.xlu1 %1115  ;;  %v1084_v36 = vpop.xlane.xlu0 %1083  ;;  %v1278_v56 = vsel %vm51_vm1, %v1219_v47, 0.0 }
 0x1e6   :  { %v1153_v37 = vmin.f32 %v1057_v31, %v1116_v35  ;;  %v1137_v43 = vmin.f32 %v1041_v38, %v1084_v36  ;;  %v1241_v38 = vsel %vm51_vm1, %v1203_v24, 0.0  ;;  %v1240_v35 = vadd.f32 %v1239_v27, %v1238_v0 }
 0x1e7   :  { %v1204_v29 = vld [vmem:[#allocation3 + $0x40] sm:$0xff]  ;;  %v1277_v36 = vadd.f32 %v1276_v18, %v1275_v61 }
 0x1e8   :  { %1186 = vst.msk [vmem:[#allocation3 + $0xd0] sm:$0xff] %vm51_vm1, %v1153_v37  ;;  %1170 = vst.msk [vmem:[#allocation3 + $0x50] sm:$0xff] %vm51_vm1, %v1137_v43  ;;  %v1220_v30 = vld [vmem:[#allocation3 + $0xc0] sm:$0xff]  ;;  %v1243_v20 = vsel %vm51_vm1, %v1204_v29, 0.0  ;;  %v1242_v42 = vadd.f32 %v1241_v38, %v1240_v35 }
 0x1e9   :  { %v1118_v1 = vpop.xlane.xlu1 %1117  ;;  %v1086_v41 = vpop.xlane.xlu0 %1085  ;;  %v1280_v8 = vsel %vm51_vm1, %v1220_v30, 0.0 }
 0x1ea   :  { %v1154_v34 = vmin.f32 %v1058_v59, %v1118_v1  ;;  %v1138_v14 = vmin.f32 %v1042_v4, %v1086_v41  ;;  %v1279_v4 = vadd.f32 %v1278_v56, %v1277_v36  ;;  %v1244_v1 = vadd.f32 %v1243_v20, %v1242_v42  ;;  %v984_v56 = vld [vmem:[%s1999_s2] sm:$0x3] }
 0x1eb   :  { %v1205_v44 = vld [vmem:[#allocation3 + $0x48] sm:$0xff] }
 0x1ec   :  { %1187 = vst.msk [vmem:[#allocation3 + $0xd8] sm:$0xff] %vm51_vm1, %v1154_v34  ;;  %1171 = vst.msk [vmem:[#allocation3 + $0x58] sm:$0xff] %vm51_vm1, %v1138_v14  ;;  %v1221_v48 = vld [vmem:[#allocation3 + $0xc8] sm:$0xff]  ;;  %v1245_v51 = vsel %vm51_vm1, %v1205_v44, 0.0  ;;  %v1281_v41 = vadd.f32 %v1280_v8, %v1279_v4 }
 0x1ed   :  { %v1120_v40 = vpop.xlane.xlu1 %1119  ;;  %v1088_v46 = vpop.xlane.xlu0 %1087  ;;  %v1282_v9 = vsel %vm51_vm1, %v1221_v48, 0.0  ;;  %v1246_v60 = vadd.f32 %v1245_v51, %v1244_v1 }
 0x1ee   :  { %v1155_v22 = vmin.f32 %v1059_v32, %v1120_v40  ;;  %v1139_v13 = vmin.f32 %v1043_v63, %v1088_v46  ;;  %v1283_v57 = vadd.f32 %v1282_v9, %v1281_v41 }
 0x1ef   :  { %v1206_v59 = vld [vmem:[#allocation3 + $0x50] sm:$0xff] }
 0x1f0   :  { %1188 = vst.msk [vmem:[#allocation3 + $0xe0] sm:$0xff] %vm51_vm1, %v1155_v22  ;;  %1172 = vst.msk [vmem:[#allocation3 + $0x60] sm:$0xff] %vm51_vm1, %v1139_v13  ;;  %v1222_v39 = vld [vmem:[#allocation3 + $0xd0] sm:$0xff]  ;;  %v1247_v10 = vsel %vm51_vm1, %v1206_v59, 0.0 }
 0x1f1   :  { %v1122_v21 = vpop.xlane.xlu1 %1121  ;;  %v1090_v28 = vpop.xlane.xlu0 %1089  ;;  %v1284_v12 = vsel %vm51_vm1, %v1222_v39, 0.0  ;;  %v1248_v40 = vadd.f32 %v1247_v10, %v1246_v60 }
 0x1f2   :  { %v1156_v31 = vmin.f32 %v1060_v2, %v1122_v21  ;;  %v1140_v33 = vmin.f32 %v1044_v58, %v1090_v28  ;;  %v1285_v46 = vadd.f32 %v1284_v12, %v1283_v57 }
 0x1f3   :  { %v1207_v11 = vld [vmem:[#allocation3 + $0x58] sm:$0xff] }
 0x1f4   :  { %1189 = vst.msk [vmem:[#allocation3 + $0xe8] sm:$0xff] %vm51_vm1, %v1156_v31  ;;  %1173 = vst.msk [vmem:[#allocation3 + $0x68] sm:$0xff] %vm51_vm1, %v1140_v33  ;;  %v1223_v45 = vld [vmem:[#allocation3 + $0xd8] sm:$0xff]  ;;  %v1249_v17 = vsel %vm51_vm1, %v1207_v11, 0.0 }
 0x1f5   :  { %v1124_v37 = vpop.xlane.xlu1 %1123  ;;  %v1092_v43 = vpop.xlane.xlu0 %1091  ;;  %v1286_v52 = vsel %vm51_vm1, %v1223_v45, 0.0  ;;  %v1250_v22 = vadd.f32 %v1249_v17, %v1248_v40 }
 0x1f6   :  { %v1157_v7 = vmin.f32 %v1061_v26, %v1124_v37  ;;  %v1141_v62 = vmin.f32 %v1045_v53, %v1092_v43  ;;  %v1287_v13 = vadd.f32 %v1286_v52, %v1285_v46 }
 0x1f7   :  { %v1208_v32 = vld [vmem:[#allocation3 + $0x60] sm:$0xff] }
 0x1f8   :  { %1190 = vst.msk [vmem:[#allocation3 + $0xf0] sm:$0xff] %vm51_vm1, %v1157_v7  ;;  %1174 = vst.msk [vmem:[#allocation3 + $0x70] sm:$0xff] %vm51_vm1, %v1141_v62  ;;  %v1224_v15 = vld [vmem:[#allocation3 + $0xe0] sm:$0xff]  ;;  %v1251_v50 = vsel %vm51_vm1, %v1208_v32, 0.0 }
 0x1f9   :  { %v1126_v34 = vpop.xlane.xlu1 %1125  ;;  %v1094_v14 = vpop.xlane.xlu0 %1093  ;;  %v1288_v6 = vsel %vm51_vm1, %v1224_v15, 0.0  ;;  %v1252_v24 = vadd.f32 %v1251_v50, %v1250_v22 }
 0x1fa   :  { %v1158_v16 = vmin.f32 %v1062_v54, %v1126_v34  ;;  %v1142_v63 = vmin.f32 %v1046_v5, %v1094_v14  ;;  %v1289_v47 = vadd.f32 %v1288_v6, %v1287_v13 }
 0x1fb   :  { %v1209_v49 = vld [vmem:[#allocation3 + $0x68] sm:$0xff] }
 0x1fc   :  { %v1225_v19 = vld [vmem:[#allocation3 + $0xe8] sm:$0xff]  ;;  %1191 = vst.msk [vmem:[#allocation3 + $0xf8] sm:$0xff] %vm51_vm1, %v1158_v16  ;;  %1175 = vst.msk [vmem:[#allocation3 + $0x78] sm:$0xff] %vm51_vm1, %v1142_v63  ;;  %v1253_v2 = vsel %vm51_vm1, %v1209_v49, 0.0 }
 0x1fd   :  { %v1290_v23 = vsel %vm51_vm1, %v1225_v19, 0.0  ;;  %v1254_v27 = vadd.f32 %v1253_v2, %v1252_v24  ;;  %v988_v53 = vpop.xlane.xlu1 %987 }
 0x1fe   :  { %v1291_v18 = vadd.f32 %v1290_v23, %v1289_v47 }
 0x1ff   :  { %v1210_v55 = vld [vmem:[#allocation3 + $0x70] sm:$0xff] }
 0x200   :  { %v1226_v58 = vld [vmem:[#allocation3 + $0xf0] sm:$0xff]  ;;  %v1255_v25 = vsel %vm51_vm1, %v1210_v55, 0.0 }
 0x201   :  { %v1292_v3 = vsel %vm51_vm1, %v1226_v58, 0.0  ;;  %v1256_v29 = vadd.f32 %v1255_v25, %v1254_v27 }
 0x202   :  { %v1293_v30 = vadd.f32 %v1292_v3, %v1291_v18 }
 0x203   :  { %v1211_v21 = vld [vmem:[#allocation3 + $0x78] sm:$0xff] }
 0x204   :  { %v1227_v28 = vld [vmem:[#allocation3 + $0xf8] sm:$0xff]  ;;  %v1257_v0 = vsel %vm51_vm1, %v1211_v21, 0.0 }
 0x205   :  { %v1294_v61 = vsel %vm51_vm1, %v1227_v28, 0.0  ;;  %v1258_v31 = vadd.f32 %v1257_v0, %v1256_v29 }
 0x206   :  { %v1295_v33 = vadd.f32 %v1294_v61, %v1293_v30 }
 0x207   :  { %v1259_v26 = vrot.slane %v1258_v31, 4 }
 0x208   :  { %v1296_v38 = vrot.slane %v1295_v33, 4 }
 0x209   :  { %v1260_v44 = vadd.f32 %v1259_v26, %v1258_v31  ;;  %v986_v35 = vpop.xlane.xlu0 %985 }
 0x20a   :  { %v1297_v48 = vadd.f32 %v1296_v38, %v1295_v33  ;;  %v992_v36 = vsel %vm991_vm4, %v988_v53, %v986_v35 }
 0x20b   :  { %v1261_v20 = vrot.slane %v1260_v44, 2  ;;  %v994_v37 = vadd.f32 %v992_v36, %v984_v56 }
 0x20c   :  { %v1298_v8 = vrot.slane %v1297_v48, 2 }
 0x20d   :  { %v1262_v43 = vadd.f32 %v1261_v20, %v1260_v44  ;;  %996 = vst.msk [vmem:[%s1999_s2] sm:$0x3] %vm49_vm3, %v994_v37 }
 0x20e   :  { %v1299_v59 = vadd.f32 %v1298_v8, %v1297_v48 }
 0x20f   :  { %v1263_v39 = vrot.slane %v1262_v43, 1 }
 0x210   :  { %v1300_v42 = vrot.slane %v1299_v59, 1 }
 0x211   :  { %v1264_v4 = vadd.f32 %v1263_v39, %v1262_v43 }
 0x212   :  { %v1301_v7 = vadd.f32 %v1300_v42, %v1299_v59 }
 0x214   :  { %v1304_v62 = vsel %vm991_vm4, %v1301_v7, %v1264_v4  ;;  %v1195_v54 = vld [vmem:[%s1999_s2] sm:$0x3] }
 0x215   :  { %v1306_v51 = vadd.f32 %v1304_v62, %v1195_v54 }
 0x217   :  { %1307 = vst.msk [vmem:[%s1999_s2] sm:$0x3] %vm49_vm3, %v1306_v51 }

</bundles_post_ra>
